<compile_context>
chip_gen: v6e
topology: v6e:2x2x1
jax: 0.10.0
libtpu: 0.0.40
codegen_flags: <defaults>
</compile_context>

<pallas_src>
import math
from functools import partial

import jax
import jax.numpy as jnp
from jax.experimental import pallas as pl
from jax.experimental.pallas import tpu as pltpu

_TB = 8  # batch tile (sublane-aligned)


# ----------------------------- Pallas kernel ------------------------------ #

def _layer_norm(x, g, b, eps=1e-12):
    mu = jnp.mean(x, axis=-1, keepdims=True)
    var = jnp.mean(jnp.square(x - mu), axis=-1, keepdims=True)
    return (x - mu) * jax.lax.rsqrt(var + eps) * g + b


def _encoder_head_kernel(x_ref, mask_ref,
                         wqkv_ref, wo_ref,
                         w1_ref, b1_ref, w2_ref,
                         wh1_ref, bh1_ref, bias_ref,
                         out_ref):
    """Synthetic transformer layer + CLS extraction + first FCN-head layer.

    x_ref   : (TB*S, H)  bf16 -- embedded + LayerNorm'd tokens (pre-flattened)
    mask_ref: (TB, S)    f32  -- attention mask in {0, 1}
    wqkv_ref: (H, 3H)    bf16 -- fused Q/K/V projection
    weights : bf16 matmul operands; biases / LN params (f32) packed in bias_ref
    out_ref : (TB, Hp)   f32  -- ReLU(cls @ Wh1 + bh1), Hp padded to 128 lanes
    """
    BS, H = x_ref.shape
    TB, S = mask_ref.shape

    x = x_ref[...]                       # bf16
    mask = mask_ref[...]                 # f32

    # Packed (1, H) rows: [bq, bk, bv, bo, ln1_g, ln1_b, b2, ln2_g, ln2_b]
    bq = bias_ref[0:1, :]
    bk = bias_ref[1:2, :]
    bv = bias_ref[2:3, :]
    bo = bias_ref[3:4, :]
    ln1_g, ln1_b = bias_ref[4:5, :], bias_ref[5:6, :]
    b2 = bias_ref[6:7, :]
    ln2_g, ln2_b = bias_ref[7:8, :], bias_ref[8:9, :]

    def mm(a, w_ref):
        # bf16 MXU path, f32 accumulation.
        return jnp.dot(a.astype(jnp.bfloat16), w_ref[...],
                       preferred_element_type=jnp.float32)

    # Fused self-attention QKV (single head — simplification of multi-head
    # DistilBERT).  Lane-aligned static slices (offsets are multiples of 128).
    qkv = mm(x, wqkv_ref)                                    # (BS, 3H) f32
    q = (qkv[:, 0 * H:1 * H] + bq).reshape(TB, S, H)
    k = (qkv[:, 1 * H:2 * H] + bk).reshape(TB, S, H)
    v = (qkv[:, 2 * H:3 * H] + bv).reshape(TB, S, H)

    scale = 1.0 / math.sqrt(H)
    scores = jnp.einsum('bqd,bkd->bqk',
                        q.astype(jnp.bfloat16), k.astype(jnp.bfloat16),
                        preferred_element_type=jnp.float32) * scale
    # Additive mask + softmax kept in f32 (bf16 would corrupt the -1e9 mask).
    scores = scores + (1.0 - mask)[:, None, :] * (-1e9)
    scores = scores - jnp.max(scores, axis=-1, keepdims=True)
    p = jnp.exp(scores)
    p = p * pl.reciprocal(jnp.sum(p, axis=-1, keepdims=True), approx=True)

    ctx = jnp.einsum('bqk,bkd->bqd',
                     p.astype(jnp.bfloat16), v.astype(jnp.bfloat16),
                     preferred_element_type=jnp.float32)          # (TB, S, H)

    attn = mm(ctx.reshape(BS, H), wo_ref) + bo
    h1 = _layer_norm(x.astype(jnp.float32) + attn, ln1_g, ln1_b)

    # Feed-forward block.
    ff = mm(h1, w1_ref) + b1_ref[...]
    ff = jax.nn.gelu(ff, approximate=True)
    ff = mm(ff, w2_ref) + b2
    h2 = _layer_norm(h1 + ff, ln2_g, ln2_b)

    # DistilBERT CLS token embedding, then head Linear(H, H/2) + ReLU
    # (zero-padded to 128 output lanes -> unmasked, lane-dense store).
    cls = h2.reshape(TB, S, H)[:, 0, :]                           # (TB, H)
    y = mm(cls, wh1_ref) + bh1_ref[...]
    out_ref[...] = jnp.maximum(y, 0.0)


# ------------------------------ JAX wrapper -------------------------------- #

def _encoder_head_call(x, mask, enc, head):
    """x: (NS, Bp*S, H) bf16, mask: (Bp, S) f32.  Returns (NS, Bp, Hp) f32."""
    NS, BS, H = x.shape
    Bp, S = mask.shape
    TB = _TB
    nb = Bp // TB
    Hp = head['wh1'].shape[-1]           # padded head width (multiple of 128)

    def wspec(arr):
        # Whole weight resident in VMEM; indexed only by the backbone axis.
        return pl.BlockSpec((None,) + arr.shape[1:], lambda s, b: (s, 0, 0))

    return pl.pallas_call(
        _encoder_head_kernel,
        out_shape=jax.ShapeDtypeStruct((NS, Bp, Hp), jnp.float32),
        grid_spec=pltpu.PrefetchScalarGridSpec(
            num_scalar_prefetch=0,
            grid=(NS, nb),
            in_specs=[
                pl.BlockSpec((None, TB * S, H), lambda s, b: (s, b, 0)),  # x
                pl.BlockSpec((TB, S), lambda s, b: (b, 0)),               # mask
                wspec(enc['wqkv']), wspec(enc['wo']),
                wspec(enc['w1']), wspec(enc['b1']), wspec(enc['w2']),
                wspec(head['wh1']), wspec(head['bh1']),
                wspec(enc['bias_pack']),
            ],
            out_specs=pl.BlockSpec((None, TB, Hp), lambda s, b: (s, b, 0)),
        ),
        compiler_params=pltpu.CompilerParams(
            dimension_semantics=("parallel", "parallel"),
        ),
    )(x, mask,
      enc['wqkv'], enc['wo'],
      enc['w1'], enc['b1'], enc['w2'],
      head['wh1'], head['bh1'], enc['bias_pack'])


def _forward_backbones(emb, enc, head, ids, mask):
    """Run NS stacked backbones + heads over a shared (NB, S) token batch."""
    NS = emb['word'].shape[0]
    NB, S = ids.shape
    H = emb['word'].shape[-1]

    Bp = ((NB + _TB - 1) // _TB) * _TB
    pad = Bp - NB
    ids_p = jnp.pad(ids, ((0, pad), (0, 0)))
    mask_p = jnp.pad(mask, ((0, pad), (0, 0))).astype(jnp.float32)

    # TODO(synk): token-embedding gather (word_emb[input_ids]) stays in JAX
    # glue — data-dependent row gather has no clean small-Pallas equivalent.
    x = emb['word'][:, ids_p] + emb['pos'][:, None, :S, :]        # (NS, Bp, S, H)
    mu = jnp.mean(x, axis=-1, keepdims=True)
    var = jnp.mean(jnp.square(x - mu), axis=-1, keepdims=True)
    x = (x - mu) * jax.lax.rsqrt(var + 1e-12) * emb['ln_g'] + emb['ln_b']
    x = x.reshape(NS, Bp * S, H).astype(jnp.bfloat16)             # pre-flattened

    y1 = _encoder_head_call(x, mask_p, enc, head)                 # (NS, Bp, Hp)
    # Final (Hp, 1) head matmul done outside the kernel (a last-dim-1 store /
    # matmul is a degenerate MXU & vst shape).  The zero-padded rows of wh2
    # match the zero-padded (and exactly-zero) columns of y1.
    y = jnp.einsum('sbh,sho->sbo', y1, head['wh2']) + head['bh2']
    return y[:, :NB]                                              # (NS, NB, 1)


def _slice_backbone(tree, idx):
    return jax.tree_util.tree_map(lambda a: a[idx:idx + 1], tree)


@partial(jax.jit, static_argnames=("training",))
def causal_sent_forward(params,
                        input_ids_real, input_ids_treated, input_ids_control,
                        attention_mask_real, attention_mask_treated,
                        attention_mask_control, training=True):
    """Mirrors CausalSent.forward (fcn heads, DistilBERT-style backbones)."""
    if training:
        B = input_ids_real.shape[0]
        ids = jnp.concatenate(
            [input_ids_real, input_ids_treated, input_ids_control], axis=0)
        mask = jnp.concatenate(
            [attention_mask_real, attention_mask_treated,
             attention_mask_control], axis=0)
        y = _forward_backbones(params['emb'], params['enc'], params['head'],
                               ids, mask)                          # (2, 3B, 1)
        riesz, sent = y[0], y[1]
        return (sent[:B], sent[B:2 * B], sent[2 * B:],
                riesz[:B], riesz[B:2 * B], riesz[2 * B:])
    else:
        emb = _slice_backbone(params['emb'], 1)    # sentiment backbone only
        enc = _slice_backbone(params['enc'], 1)
        head = _slice_backbone(params['head'], 1)
        y = _forward_backbones(emb, enc, head,
                               input_ids_real, attention_mask_real)
        return y[0]                                                # (B, 1)


# --------------------------- deterministic init ---------------------------- #

def _xavier_uniform(key, fan_in, fan_out):
    bound = math.sqrt(6.0 / (fan_in + fan_out))
    return jax.random.uniform(key, (fan_in, fan_out), jnp.float32, -bound, bound)


def _init_one_encoder(key, H, F):
    # TODO(synk): pretrained DistilBERT/LLaMA weights cannot be loaded; the
    # frozen backbone is a deterministic synthetic single-layer encoder.
    ks = jax.random.split(key, 4)
    lin = lambda k, i, o: (0.02 * jax.random.normal(k, (i, o), jnp.float32)
                           ).astype(jnp.bfloat16)
    zH = jnp.zeros((1, H), jnp.float32)
    oneH = jnp.ones((1, H), jnp.float32)
    # packed rows: [bq, bk, bv, bo, ln1_g, ln1_b, b2, ln2_g, ln2_b]
    bias_pack = jnp.concatenate([zH, zH, zH, zH, oneH, zH, zH, oneH, zH], 0)
    return dict(
        wqkv=lin(ks[0], H, 3 * H),            # fused Q/K/V projection
        wo=lin(ks[1], H, H),
        w1=lin(ks[2], H, F), b1=jnp.zeros((1, F), jnp.float32),
        w2=lin(ks[3], F, H),
        bias_pack=bias_pack,
    )


def _init_one_head(key, H):
    # RieszHead / SentimentHead 'fcn': hidden_size = backbone_hidden_size // 2,
    # xavier_uniform weights + zero biases (per initialize_weights).
    # The first-layer width is zero-padded to a multiple of 128 lanes; padded
    # columns (and the matching wh2 rows) are zero, so the result is identical.
    Hh = H // 2
    Hp = ((Hh + 127) // 128) * 128
    k1, k2 = jax.random.split(key)
    wh1 = _xavier_uniform(k1, H, Hh)
    wh1 = jnp.pad(wh1, ((0, 0), (0, Hp - Hh)))
    wh2 = _xavier_uniform(k2, Hh, 1)
    wh2 = jnp.pad(wh2, ((0, Hp - Hh), (0, 0)))
    return dict(
        wh1=wh1.astype(jnp.bfloat16),
        bh1=jnp.zeros((1, Hp), jnp.float32),
        wh2=wh2,
        bh2=jnp.zeros((1, 1), jnp.float32),
    )


def _init_one_emb(key, V, S, H):
    k1, k2 = jax.random.split(key)
    return dict(
        word=0.02 * jax.random.normal(k1, (V, H), jnp.float32),
        pos=0.02 * jax.random.normal(k2, (S, H), jnp.float32),
        ln_g=jnp.ones((1, 1, H), jnp.float32),
        ln_b=jnp.zeros((1, 1, H), jnp.float32),
    )


def init_causal_sent_params(key, vocab, seq, hidden, ffn):
    ks = jax.random.split(key, 6)
    stack = lambda a, b: jax.tree_util.tree_map(lambda u, v: jnp.stack([u, v]),
                                                a, b)
    # stack index 0 = riesz, 1 = sentiment
    return dict(
        emb=stack(_init_one_emb(ks[0], vocab, seq, hidden),
                  _init_one_emb(ks[1], vocab, seq, hidden)),
        enc=stack(_init_one_encoder(ks[2], hidden, ffn),
                  _init_one_encoder(ks[3], hidden, ffn)),
        head=stack(_init_one_head(ks[4], hidden),
                   _init_one_head(ks[5], hidden)),
    )


# ---------------------------------- main ----------------------------------- #

if __name__ == "__main__":
    # Lane-aligned small config (H multiple of 128 so the MXU/vregs are fed).
    B, S, H, F, V = 2, 8, 128, 256, 50

    key = jax.random.PRNGKey(0)
    k_param, k_r, k_t, k_c = jax.random.split(key, 4)
    params = init_causal_sent_params(k_param, V, S, H, F)

    ids_real = jax.random.randint(k_r, (B, S), 0, V)
    ids_treated = jax.random.randint(k_t, (B, S), 0, V)
    ids_control = jax.random.randint(k_c, (B, S), 0, V)
    mask_real = jnp.ones((B, S), jnp.int32).at[1, 6:].set(0)
    mask_treated = jnp.ones((B, S), jnp.int32).at[0, 7:].set(0)
    mask_control = jnp.ones((B, S), jnp.int32)

    # training-mode forward: 6 outputs, each (B, 1)
    outs = causal_sent_forward(params,
                               ids_real, ids_treated, ids_control,
                               mask_real, mask_treated, mask_control,
                               training=True)
    outs = jax.block_until_ready(outs)
    assert len(outs) == 6 and all(o.shape == (B, 1) for o in outs)
    assert all(bool(jnp.all(jnp.isfinite(o))) for o in outs)

    # eval-mode forward: sentiment head on real input only, (B, 1)
    eval_out = causal_sent_forward(params,
                                   ids_real, ids_treated, ids_control,
                                   mask_real, mask_treated, mask_control,
                                   training=False)
    eval_out = jax.block_until_ready(eval_out)
    assert eval_out.shape == (B, 1)
    assert bool(jnp.all(jnp.isfinite(eval_out)))

    print("KERNEL_OK")
</pallas_src>

<mosaic_0001>
module attributes {stable_mosaic.version = 11 : i64} {
  func.func @_encoder_head_kernel(%arg0: i32, %arg1: i32, %arg2: memref<1x64x128xbf16, #tpu.memory_space<vmem>>, %arg3: memref<8x8xf32, #tpu.memory_space<vmem>>, %arg4: memref<1x128x384xbf16, #tpu.memory_space<vmem>>, %arg5: memref<1x128x128xbf16, #tpu.memory_space<vmem>>, %arg6: memref<1x128x256xbf16, #tpu.memory_space<vmem>>, %arg7: memref<1x1x256xf32, #tpu.memory_space<vmem>>, %arg8: memref<1x256x128xbf16, #tpu.memory_space<vmem>>, %arg9: memref<1x128x128xbf16, #tpu.memory_space<vmem>>, %arg10: memref<1x1x128xf32, #tpu.memory_space<vmem>>, %arg11: memref<1x9x128xf32, #tpu.memory_space<vmem>>, %arg12: memref<1x8x128xf32, #tpu.memory_space<vmem>>) attributes {dimension_semantics = [#tpu.dimension_semantics<parallel>, #tpu.dimension_semantics<parallel>], iteration_bounds = array<i64: 2, 1>, scalar_prefetch = 0 : i64, scratch_operands = 0 : i64, tpu.core_type = #tpu.core_type<tc>, window_params = [{transform_indices = @transform_0, window_bounds = array<i64: 1, 64, 128>}, {transform_indices = @transform_1, window_bounds = array<i64: 8, 8>}, {transform_indices = @transform_2, window_bounds = array<i64: 1, 128, 384>}, {transform_indices = @transform_3, window_bounds = array<i64: 1, 128, 128>}, {transform_indices = @transform_4, window_bounds = array<i64: 1, 128, 256>}, {transform_indices = @transform_5, window_bounds = array<i64: 1, 1, 256>}, {transform_indices = @transform_6, window_bounds = array<i64: 1, 256, 128>}, {transform_indices = @transform_7, window_bounds = array<i64: 1, 128, 128>}, {transform_indices = @transform_8, window_bounds = array<i64: 1, 1, 128>}, {transform_indices = @transform_9, window_bounds = array<i64: 1, 9, 128>}, {transform_indices = @transform_10, window_bounds = array<i64: 1, 8, 128>}]} {
    %c0 = arith.constant 0 : index
    %c0_0 = arith.constant 0 : index
    %c0_1 = arith.constant 0 : index
    %0 = vector.load %arg2[%c0, %c0_0, %c0_1] : memref<1x64x128xbf16, #tpu.memory_space<vmem>>, vector<1x64x128xbf16>
    %1 = vector.shape_cast %0 : vector<1x64x128xbf16> to vector<64x128xbf16>
    %c0_2 = arith.constant 0 : index
    %c0_3 = arith.constant 0 : index
    %2 = vector.load %arg3[%c0_2, %c0_3] : memref<8x8xf32, #tpu.memory_space<vmem>>, vector<8x8xf32>
    %c0_4 = arith.constant 0 : index
    %c0_5 = arith.constant 0 : index
    %c0_6 = arith.constant 0 : index
    %3 = vector.load %arg11[%c0_4, %c0_5, %c0_6] : memref<1x9x128xf32, #tpu.memory_space<vmem>>, vector<1x1x128xf32>
    %4 = vector.shape_cast %3 : vector<1x1x128xf32> to vector<1x128xf32>
    %c0_7 = arith.constant 0 : index
    %c1 = arith.constant 1 : index
    %c0_8 = arith.constant 0 : index
    %5 = vector.load %arg11[%c0_7, %c1, %c0_8] : memref<1x9x128xf32, #tpu.memory_space<vmem>>, vector<1x1x128xf32>
    %6 = vector.shape_cast %5 : vector<1x1x128xf32> to vector<1x128xf32>
    %c0_9 = arith.constant 0 : index
    %c2 = arith.constant 2 : index
    %c0_10 = arith.constant 0 : index
    %7 = vector.load %arg11[%c0_9, %c2, %c0_10] : memref<1x9x128xf32, #tpu.memory_space<vmem>>, vector<1x1x128xf32>
    %8 = vector.shape_cast %7 : vector<1x1x128xf32> to vector<1x128xf32>
    %c0_11 = arith.constant 0 : index
    %c3 = arith.constant 3 : index
    %c0_12 = arith.constant 0 : index
    %9 = vector.load %arg11[%c0_11, %c3, %c0_12] : memref<1x9x128xf32, #tpu.memory_space<vmem>>, vector<1x1x128xf32>
    %10 = vector.shape_cast %9 : vector<1x1x128xf32> to vector<1x128xf32>
    %c0_13 = arith.constant 0 : index
    %c4 = arith.constant 4 : index
    %c0_14 = arith.constant 0 : index
    %11 = vector.load %arg11[%c0_13, %c4, %c0_14] : memref<1x9x128xf32, #tpu.memory_space<vmem>>, vector<1x1x128xf32>
    %12 = vector.shape_cast %11 : vector<1x1x128xf32> to vector<1x128xf32>
    %c0_15 = arith.constant 0 : index
    %c5 = arith.constant 5 : index
    %c0_16 = arith.constant 0 : index
    %13 = vector.load %arg11[%c0_15, %c5, %c0_16] : memref<1x9x128xf32, #tpu.memory_space<vmem>>, vector<1x1x128xf32>
    %14 = vector.shape_cast %13 : vector<1x1x128xf32> to vector<1x128xf32>
    %c0_17 = arith.constant 0 : index
    %c6 = arith.constant 6 : index
    %c0_18 = arith.constant 0 : index
    %15 = vector.load %arg11[%c0_17, %c6, %c0_18] : memref<1x9x128xf32, #tpu.memory_space<vmem>>, vector<1x1x128xf32>
    %16 = vector.shape_cast %15 : vector<1x1x128xf32> to vector<1x128xf32>
    %c0_19 = arith.constant 0 : index
    %c7 = arith.constant 7 : index
    %c0_20 = arith.constant 0 : index
    %17 = vector.load %arg11[%c0_19, %c7, %c0_20] : memref<1x9x128xf32, #tpu.memory_space<vmem>>, vector<1x1x128xf32>
    %18 = vector.shape_cast %17 : vector<1x1x128xf32> to vector<1x128xf32>
    %c0_21 = arith.constant 0 : index
    %c8 = arith.constant 8 : index
    %c0_22 = arith.constant 0 : index
    %19 = vector.load %arg11[%c0_21, %c8, %c0_22] : memref<1x9x128xf32, #tpu.memory_space<vmem>>, vector<1x1x128xf32>
    %20 = vector.shape_cast %19 : vector<1x1x128xf32> to vector<1x128xf32>
    %c0_23 = arith.constant 0 : index
    %c0_24 = arith.constant 0 : index
    %c0_25 = arith.constant 0 : index
    %21 = vector.load %arg4[%c0_23, %c0_24, %c0_25] : memref<1x128x384xbf16, #tpu.memory_space<vmem>>, vector<1x128x384xbf16>
    %22 = vector.shape_cast %21 : vector<1x128x384xbf16> to vector<128x384xbf16>
    %cst = arith.constant dense<0.000000e+00> : vector<64x384xf32>
    %23 = tpu.matmul %1, %22, %cst {dimension_numbers = #tpu.dot_dimension_numbers<[1], [0], [0], [1], [0, 0, 1, 1], [], []>} : vector<64x128xbf16>, vector<128x384xbf16>, vector<64x384xf32> -> vector<64x384xf32>
    %24 = vector.extract_strided_slice %23 {offsets = [0, 0], sizes = [64, 128], strides = [1, 1]} : vector<64x384xf32> to vector<64x128xf32>
    %25 = vector.broadcast %4 : vector<1x128xf32> to vector<64x128xf32>
    %26 = arith.addf %24, %25 : vector<64x128xf32>
    %27 = vector.shape_cast %26 : vector<64x128xf32> to vector<8x8x128xf32>
    %28 = vector.extract_strided_slice %23 {offsets = [0, 128], sizes = [64, 128], strides = [1, 1]} : vector<64x384xf32> to vector<64x128xf32>
    %29 = vector.broadcast %6 : vector<1x128xf32> to vector<64x128xf32>
    %30 = arith.addf %28, %29 : vector<64x128xf32>
    %31 = vector.shape_cast %30 : vector<64x128xf32> to vector<8x8x128xf32>
    %32 = vector.extract_strided_slice %23 {offsets = [0, 256], sizes = [64, 128], strides = [1, 1]} : vector<64x384xf32> to vector<64x128xf32>
    %33 = vector.broadcast %8 : vector<1x128xf32> to vector<64x128xf32>
    %34 = arith.addf %32, %33 : vector<64x128xf32>
    %35 = vector.shape_cast %34 : vector<64x128xf32> to vector<8x8x128xf32>
    %36 = arith.truncf %27 : vector<8x8x128xf32> to vector<8x8x128xbf16>
    %37 = arith.truncf %31 : vector<8x8x128xf32> to vector<8x8x128xbf16>
    "tpu.trace_start"() <{level = 10 : i32, message = "bqd,bkd->bqk"}> : () -> ()
    %cst_26 = arith.constant dense<0.000000e+00> : vector<8x8x8xf32>
    %38 = tpu.matmul %36, %37, %cst_26 {dimension_numbers = #tpu.dot_dimension_numbers<[2], [2], [1], [1], [0, 0, 0, 1, 1, 1], [0], [0]>} : vector<8x8x128xbf16>, vector<8x8x128xbf16>, vector<8x8x8xf32> -> vector<8x8x8xf32>
    "tpu.trace_stop"() : () -> ()
    %cst_27 = arith.constant 0.0883883461 : f32
    %39 = vector.broadcast %cst_27 : f32 to vector<8x8x8xf32>
    %40 = arith.mulf %38, %39 : vector<8x8x8xf32>
    %cst_28 = arith.constant 1.000000e+00 : f32
    %41 = vector.broadcast %cst_28 : f32 to vector<8x8xf32>
    %42 = arith.subf %41, %2 : vector<8x8xf32>
    %43 = vector.shape_cast %42 : vector<8x8xf32> to vector<8x1x8xf32>
    %cst_29 = arith.constant -1.000000e+09 : f32
    %44 = vector.broadcast %cst_29 : f32 to vector<8x1x8xf32>
    %45 = arith.mulf %43, %44 : vector<8x1x8xf32>
    %46 = vector.broadcast %45 : vector<8x1x8xf32> to vector<8x8x8xf32>
    %47 = arith.addf %40, %46 : vector<8x8x8xf32>
    %cst_30 = arith.constant dense<0xFF800000> : vector<8x8xf32>
    %48 = vector.multi_reduction <maximumf>, %47, %cst_30 [2] : vector<8x8x8xf32> to vector<8x8xf32>
    %49 = vector.shape_cast %48 : vector<8x8xf32> to vector<8x8x1xf32>
    %50 = vector.broadcast %49 : vector<8x8x1xf32> to vector<8x8x8xf32>
    %51 = arith.subf %47, %50 : vector<8x8x8xf32>
    %52 = math.exp %51 : vector<8x8x8xf32>
    %cst_31 = arith.constant dense<0.000000e+00> : vector<8x8xf32>
    %53 = vector.multi_reduction <add>, %52, %cst_31 [2] : vector<8x8x8xf32> to vector<8x8xf32>
    %54 = vector.shape_cast %53 : vector<8x8xf32> to vector<8x8x1xf32>
    %55 = tpu.reciprocal %54 {approx = true} : vector<8x8x1xf32> -> vector<8x8x1xf32>
    %56 = vector.broadcast %55 : vector<8x8x1xf32> to vector<8x8x8xf32>
    %57 = arith.mulf %52, %56 : vector<8x8x8xf32>
    %58 = arith.truncf %57 : vector<8x8x8xf32> to vector<8x8x8xbf16>
    %59 = arith.truncf %35 : vector<8x8x128xf32> to vector<8x8x128xbf16>
    "tpu.trace_start"() <{level = 10 : i32, message = "bqk,bkd->bqd"}> : () -> ()
    %cst_32 = arith.constant dense<0.000000e+00> : vector<8x8x128xf32>
    %60 = tpu.matmul %58, %59, %cst_32 {dimension_numbers = #tpu.dot_dimension_numbers<[2], [1], [1], [2], [0, 0, 0, 1, 1, 2], [0], [0]>} : vector<8x8x8xbf16>, vector<8x8x128xbf16>, vector<8x8x128xf32> -> vector<8x8x128xf32>
    "tpu.trace_stop"() : () -> ()
    %61 = vector.shape_cast %60 : vector<8x8x128xf32> to vector<64x128xf32>
    %62 = arith.truncf %61 : vector<64x128xf32> to vector<64x128xbf16>
    %c0_33 = arith.constant 0 : index
    %c0_34 = arith.constant 0 : index
    %c0_35 = arith.constant 0 : index
    %63 = vector.load %arg5[%c0_33, %c0_34, %c0_35] : memref<1x128x128xbf16, #tpu.memory_space<vmem>>, vector<1x128x128xbf16>
    %64 = vector.shape_cast %63 : vector<1x128x128xbf16> to vector<128x128xbf16>
    %cst_36 = arith.constant dense<0.000000e+00> : vector<64x128xf32>
    %65 = tpu.matmul %62, %64, %cst_36 {dimension_numbers = #tpu.dot_dimension_numbers<[1], [0], [0], [1], [0, 0, 1, 1], [], []>} : vector<64x128xbf16>, vector<128x128xbf16>, vector<64x128xf32> -> vector<64x128xf32>
    %66 = vector.broadcast %10 : vector<1x128xf32> to vector<64x128xf32>
    %67 = arith.addf %65, %66 : vector<64x128xf32>
    %68 = arith.extf %1 : vector<64x128xbf16> to vector<64x128xf32>
    %69 = arith.addf %68, %67 : vector<64x128xf32>
    %cst_37 = arith.constant dense<0.000000e+00> : vector<64xf32>
    %70 = vector.multi_reduction <add>, %69, %cst_37 [1] : vector<64x128xf32> to vector<64xf32>
    %71 = vector.shape_cast %70 : vector<64xf32> to vector<64x1xf32>
    %cst_38 = arith.constant 1.280000e+02 : f32
    %72 = vector.broadcast %cst_38 : f32 to vector<64x1xf32>
    %73 = arith.divf %71, %72 : vector<64x1xf32>
    %74 = vector.broadcast %73 : vector<64x1xf32> to vector<64x128xf32>
    %75 = arith.subf %69, %74 : vector<64x128xf32>
    %76 = arith.mulf %75, %75 : vector<64x128xf32>
    %cst_39 = arith.constant dense<0.000000e+00> : vector<64xf32>
    %77 = vector.multi_reduction <add>, %76, %cst_39 [1] : vector<64x128xf32> to vector<64xf32>
    %78 = vector.shape_cast %77 : vector<64xf32> to vector<64x1xf32>
    %cst_40 = arith.constant 1.280000e+02 : f32
    %79 = vector.broadcast %cst_40 : f32 to vector<64x1xf32>
    %80 = arith.divf %78, %79 : vector<64x1xf32>
    %81 = vector.broadcast %73 : vector<64x1xf32> to vector<64x128xf32>
    %82 = arith.subf %69, %81 : vector<64x128xf32>
    %cst_41 = arith.constant 9.99999996E-13 : f32
    %83 = vector.broadcast %cst_41 : f32 to vector<64x1xf32>
    %84 = arith.addf %80, %83 : vector<64x1xf32>
    %85 = math.rsqrt %84 : vector<64x1xf32>
    %86 = vector.broadcast %85 : vector<64x1xf32> to vector<64x128xf32>
    %87 = arith.mulf %82, %86 : vector<64x128xf32>
    %88 = vector.broadcast %12 : vector<1x128xf32> to vector<64x128xf32>
    %89 = arith.mulf %87, %88 : vector<64x128xf32>
    %90 = vector.broadcast %14 : vector<1x128xf32> to vector<64x128xf32>
    %91 = arith.addf %89, %90 : vector<64x128xf32>
    %92 = arith.truncf %91 : vector<64x128xf32> to vector<64x128xbf16>
    %c0_42 = arith.constant 0 : index
    %c0_43 = arith.constant 0 : index
    %c0_44 = arith.constant 0 : index
    %93 = vector.load %arg6[%c0_42, %c0_43, %c0_44] : memref<1x128x256xbf16, #tpu.memory_space<vmem>>, vector<1x128x256xbf16>
    %94 = vector.shape_cast %93 : vector<1x128x256xbf16> to vector<128x256xbf16>
    %cst_45 = arith.constant dense<0.000000e+00> : vector<64x256xf32>
    %95 = tpu.matmul %92, %94, %cst_45 {dimension_numbers = #tpu.dot_dimension_numbers<[1], [0], [0], [1], [0, 0, 1, 1], [], []>} : vector<64x128xbf16>, vector<128x256xbf16>, vector<64x256xf32> -> vector<64x256xf32>
    %c0_46 = arith.constant 0 : index
    %c0_47 = arith.constant 0 : index
    %c0_48 = arith.constant 0 : index
    %96 = vector.load %arg7[%c0_46, %c0_47, %c0_48] : memref<1x1x256xf32, #tpu.memory_space<vmem>>, vector<1x1x256xf32>
    %97 = vector.shape_cast %96 : vector<1x1x256xf32> to vector<1x256xf32>
    %98 = vector.broadcast %97 : vector<1x256xf32> to vector<64x256xf32>
    %99 = arith.addf %95, %98 : vector<64x256xf32>
    %100 = arith.mulf %99, %99 : vector<64x256xf32>
    %101 = arith.mulf %99, %100 : vector<64x256xf32>
    %cst_49 = arith.constant 4.471500e-02 : f32
    %102 = vector.broadcast %cst_49 : f32 to vector<64x256xf32>
    %103 = arith.mulf %102, %101 : vector<64x256xf32>
    %104 = arith.addf %99, %103 : vector<64x256xf32>
    %cst_50 = arith.constant 0.797884583 : f32
    %105 = vector.broadcast %cst_50 : f32 to vector<64x256xf32>
    %106 = arith.mulf %105, %104 : vector<64x256xf32>
    %107 = math.tanh %106 : vector<64x256xf32>
    %cst_51 = arith.constant 1.000000e+00 : f32
    %108 = vector.broadcast %cst_51 : f32 to vector<64x256xf32>
    %109 = arith.addf %108, %107 : vector<64x256xf32>
    %cst_52 = arith.constant 5.000000e-01 : f32
    %110 = vector.broadcast %cst_52 : f32 to vector<64x256xf32>
    %111 = arith.mulf %110, %109 : vector<64x256xf32>
    %112 = arith.mulf %99, %111 : vector<64x256xf32>
    %113 = arith.truncf %112 : vector<64x256xf32> to vector<64x256xbf16>
    %c0_53 = arith.constant 0 : index
    %c0_54 = arith.constant 0 : index
    %c0_55 = arith.constant 0 : index
    %114 = vector.load %arg8[%c0_53, %c0_54, %c0_55] : memref<1x256x128xbf16, #tpu.memory_space<vmem>>, vector<1x256x128xbf16>
    %115 = vector.shape_cast %114 : vector<1x256x128xbf16> to vector<256x128xbf16>
    %cst_56 = arith.constant dense<0.000000e+00> : vector<64x128xf32>
    %116 = tpu.matmul %113, %115, %cst_56 {dimension_numbers = #tpu.dot_dimension_numbers<[1], [0], [0], [1], [0, 0, 1, 1], [], []>} : vector<64x256xbf16>, vector<256x128xbf16>, vector<64x128xf32> -> vector<64x128xf32>
    %117 = vector.broadcast %16 : vector<1x128xf32> to vector<64x128xf32>
    %118 = arith.addf %116, %117 : vector<64x128xf32>
    %119 = arith.addf %91, %118 : vector<64x128xf32>
    %cst_57 = arith.constant dense<0.000000e+00> : vector<64xf32>
    %120 = vector.multi_reduction <add>, %119, %cst_57 [1] : vector<64x128xf32> to vector<64xf32>
    %121 = vector.shape_cast %120 : vector<64xf32> to vector<64x1xf32>
    %cst_58 = arith.constant 1.280000e+02 : f32
    %122 = vector.broadcast %cst_58 : f32 to vector<64x1xf32>
    %123 = arith.divf %121, %122 : vector<64x1xf32>
    %124 = vector.broadcast %123 : vector<64x1xf32> to vector<64x128xf32>
    %125 = arith.subf %119, %124 : vector<64x128xf32>
    %126 = arith.mulf %125, %125 : vector<64x128xf32>
    %cst_59 = arith.constant dense<0.000000e+00> : vector<64xf32>
    %127 = vector.multi_reduction <add>, %126, %cst_59 [1] : vector<64x128xf32> to vector<64xf32>
    %128 = vector.shape_cast %127 : vector<64xf32> to vector<64x1xf32>
    %cst_60 = arith.constant 1.280000e+02 : f32
    %129 = vector.broadcast %cst_60 : f32 to vector<64x1xf32>
    %130 = arith.divf %128, %129 : vector<64x1xf32>
    %131 = vector.broadcast %123 : vector<64x1xf32> to vector<64x128xf32>
    %132 = arith.subf %119, %131 : vector<64x128xf32>
    %cst_61 = arith.constant 9.99999996E-13 : f32
    %133 = vector.broadcast %cst_61 : f32 to vector<64x1xf32>
    %134 = arith.addf %130, %133 : vector<64x1xf32>
    %135 = math.rsqrt %134 : vector<64x1xf32>
    %136 = vector.broadcast %135 : vector<64x1xf32> to vector<64x128xf32>
    %137 = arith.mulf %132, %136 : vector<64x128xf32>
    %138 = vector.broadcast %18 : vector<1x128xf32> to vector<64x128xf32>
    %139 = arith.mulf %137, %138 : vector<64x128xf32>
    %140 = vector.broadcast %20 : vector<1x128xf32> to vector<64x128xf32>
    %141 = arith.addf %139, %140 : vector<64x128xf32>
    %142 = vector.shape_cast %141 : vector<64x128xf32> to vector<8x8x128xf32>
    %143 = vector.extract_strided_slice %142 {offsets = [0, 0, 0], sizes = [8, 1, 128], strides = [1, 1, 1]} : vector<8x8x128xf32> to vector<8x1x128xf32>
    %144 = vector.shape_cast %143 : vector<8x1x128xf32> to vector<8x128xf32>
    %145 = arith.truncf %144 : vector<8x128xf32> to vector<8x128xbf16>
    %c0_62 = arith.constant 0 : index
    %c0_63 = arith.constant 0 : index
    %c0_64 = arith.constant 0 : index
    %146 = vector.load %arg9[%c0_62, %c0_63, %c0_64] : memref<1x128x128xbf16, #tpu.memory_space<vmem>>, vector<1x128x128xbf16>
    %147 = vector.shape_cast %146 : vector<1x128x128xbf16> to vector<128x128xbf16>
    %cst_65 = arith.constant dense<0.000000e+00> : vector<8x128xf32>
    %148 = tpu.matmul %145, %147, %cst_65 {dimension_numbers = #tpu.dot_dimension_numbers<[1], [0], [0], [1], [0, 0, 1, 1], [], []>} : vector<8x128xbf16>, vector<128x128xbf16>, vector<8x128xf32> -> vector<8x128xf32>
    %c0_66 = arith.constant 0 : index
    %c0_67 = arith.constant 0 : index
    %c0_68 = arith.constant 0 : index
    %149 = vector.load %arg10[%c0_66, %c0_67, %c0_68] : memref<1x1x128xf32, #tpu.memory_space<vmem>>, vector<1x1x128xf32>
    %150 = vector.shape_cast %149 : vector<1x1x128xf32> to vector<1x128xf32>
    %151 = vector.broadcast %150 : vector<1x128xf32> to vector<8x128xf32>
    %152 = arith.addf %148, %151 : vector<8x128xf32>
    %cst_69 = arith.constant 0.000000e+00 : f32
    %153 = vector.broadcast %cst_69 : f32 to vector<8x128xf32>
    %154 = arith.maximumf %152, %153 : vector<8x128xf32>
    %c0_70 = arith.constant 0 : index
    %c0_71 = arith.constant 0 : index
    %c0_72 = arith.constant 0 : index
    %155 = vector.load %arg12[%c0_70, %c0_71, %c0_72] : memref<1x8x128xf32, #tpu.memory_space<vmem>>, vector<1x8x128xf32>
    %156 = vector.shape_cast %155 : vector<1x8x128xf32> to vector<8x128xf32>
    %157 = vector.shape_cast %154 : vector<8x128xf32> to vector<1x8x128xf32>
    tpu.vector_store %arg12[%c0_70, %c0_71, %c0_72], %157 {strides = array<i32>} : memref<1x8x128xf32, #tpu.memory_space<vmem>>, vector<1x8x128xf32>,
    return
  }
  func.func @transform_0(%arg0: i32, %arg1: i32) -> (i32, i32, i32) {
    %c0_i32 = arith.constant 0 : i32
    %c0_i32_0 = arith.constant 0 : i32
    return %arg0, %arg1, %c0_i32 : i32, i32, i32
  }
  func.func @transform_1(%arg0: i32, %arg1: i32) -> (i32, i32) {
    %c0_i32 = arith.constant 0 : i32
    %c0_i32_0 = arith.constant 0 : i32
    return %arg1, %c0_i32 : i32, i32
  }
  func.func @transform_2(%arg0: i32, %arg1: i32) -> (i32, i32, i32) {
    %c0_i32 = arith.constant 0 : i32
    %c0_i32_0 = arith.constant 0 : i32
    %c0_i32_1 = arith.constant 0 : i32
    return %arg0, %c0_i32, %c0_i32_0 : i32, i32, i32
  }
  func.func @transform_3(%arg0: i32, %arg1: i32) -> (i32, i32, i32) {
    %c0_i32 = arith.constant 0 : i32
    %c0_i32_0 = arith.constant 0 : i32
    %c0_i32_1 = arith.constant 0 : i32
    return %arg0, %c0_i32, %c0_i32_0 : i32, i32, i32
  }
  func.func @transform_4(%arg0: i32, %arg1: i32) -> (i32, i32, i32) {
    %c0_i32 = arith.constant 0 : i32
    %c0_i32_0 = arith.constant 0 : i32
    %c0_i32_1 = arith.constant 0 : i32
    return %arg0, %c0_i32, %c0_i32_0 : i32, i32, i32
  }
  func.func @transform_5(%arg0: i32, %arg1: i32) -> (i32, i32, i32) {
    %c0_i32 = arith.constant 0 : i32
    %c0_i32_0 = arith.constant 0 : i32
    %c0_i32_1 = arith.constant 0 : i32
    return %arg0, %c0_i32, %c0_i32_0 : i32, i32, i32
  }
  func.func @transform_6(%arg0: i32, %arg1: i32) -> (i32, i32, i32) {
    %c0_i32 = arith.constant 0 : i32
    %c0_i32_0 = arith.constant 0 : i32
    %c0_i32_1 = arith.constant 0 : i32
    return %arg0, %c0_i32, %c0_i32_0 : i32, i32, i32
  }
  func.func @transform_7(%arg0: i32, %arg1: i32) -> (i32, i32, i32) {
    %c0_i32 = arith.constant 0 : i32
    %c0_i32_0 = arith.constant 0 : i32
    %c0_i32_1 = arith.constant 0 : i32
    return %arg0, %c0_i32, %c0_i32_0 : i32, i32, i32
  }
  func.func @transform_8(%arg0: i32, %arg1: i32) -> (i32, i32, i32) {
    %c0_i32 = arith.constant 0 : i32
    %c0_i32_0 = arith.constant 0 : i32
    %c0_i32_1 = arith.constant 0 : i32
    return %arg0, %c0_i32, %c0_i32_0 : i32, i32, i32
  }
  func.func @transform_9(%arg0: i32, %arg1: i32) -> (i32, i32, i32) {
    %c0_i32 = arith.constant 0 : i32
    %c0_i32_0 = arith.constant 0 : i32
    %c0_i32_1 = arith.constant 0 : i32
    return %arg0, %c0_i32, %c0_i32_0 : i32, i32, i32
  }
  func.func @transform_10(%arg0: i32, %arg1: i32) -> (i32, i32, i32) {
    %c0_i32 = arith.constant 0 : i32
    %c0_i32_0 = arith.constant 0 : i32
    return %arg0, %arg1, %c0_i32 : i32, i32, i32
  }
}

</mosaic_0001>

<bundles_post_ra>
// kernel: causal_sent_forward.1
= control target key start
LH: loop header
LB: loop body
LE: loop exit
PB: predicated region body
PF: predicated region fallthrough
CT: control target
= control target key end

     0   :  { %s4764_s0 = inlined_call_operand.vmem [shape: bf16[2,64,128], index: 0, kind: input, shape index: {}]   ;;  %s4765_s1 = inlined_call_operand.vmem [shape: f32[8,8], index: 1, kind: input, shape index: {}]   ;;  %s4766_s2 = inlined_call_operand.vmem [shape: bf16[2,128,384], index: 2, kind: input, shape index: {}]   ;;  %s4767_s3 = inlined_call_operand.vmem [shape: bf16[2,128,128], index: 3, kind: input, shape index: {}]   ;;  %s4768_s4 = inlined_call_operand.vmem [shape: bf16[2,128,256], index: 4, kind: input, shape index: {}]   ;;  %s4769_s5 = inlined_call_operand.hbm [shape: f32[2,1,256], index: 5, kind: input, shape index: {}]   ;;  %s4770_s6 = inlined_call_operand.vmem [shape: bf16[2,256,128], index: 6, kind: input, shape index: {}]   ;;  %s4771_s7 = inlined_call_operand.hbm [shape: bf16[2,128,128], index: 7, kind: input, shape index: {}]   ;;  %s4772_s8 = inlined_call_operand.vmem [shape: f32[2,1,128], index: 8, kind: input, shape index: {}]   ;;  %s4773_s9 = inlined_call_operand.vmem [shape: f32[2,9,128], index: 9, kind: input, shape index: {}]   ;;  %s4774_s10 = inlined_call_operand.vmem [shape: f32[2,8,128], index: 10, kind: output, shape index: {}]  }
   0x1   :  { %4776 = sst [smem:[#allocation10_spill]] %s4769_s5 }
   0x2   :  { %15 = vsyncpa [#allocation3], 0 }
   0x3   :  { %17 = vsyncpa [#allocation3 + $0x1], 0 }
   0x4   :  { %18 = vsyncpa [#allocation5], 0 }
   0x5   :  { %20 = vsyncpa [#allocation5 + $0x1], 0  ;;  %s4042_s13 = smov 0   ;;  %s4044_s14 = smov 0  }
   0x6   :  { %s4046_s15 = smov 0   ;;  %s4048_s16 = smov 0  }
   0x7   :  { %s4050_s17 = smov 0   ;;  %s4052_s18 = smov 0  }
   0x8 LB: > { %s3209_s19 = sadd.s32 4294967295, %s3977_s18   ;;  %s38_s20 = sadd.s32 1, %s3973_s17  ;;  %s3977_s18 = sphi %s4052_s18, %s26_s18   ;;  %s3973_s17 = sphi %s4050_s17, %s4790_s17   ;;  %s3969_s16 = sphi %s4048_s16, %s4789_s16   ;;  %s3965_s15 = sphi %s4046_s15, %s4788_s15   ;;  %s3961_s14 = sphi %s4044_s14, %s4787_s14   ;;  %s3957_s13 = sphi %s4042_s13, %s4786_s13  }
   0x9   : > { %p40_p0 = scmp.ge.s32.totalorder %s38_s20, 2  ;;  %s177_s21 = sadd.s32 1, %s3965_s15 }
   0xa   : > { %p184_p1 = scmp.ne.s32.totalorder %s3965_s15, %s3961_s14  ;;  %p185_p2 = scmp.eq.s32.totalorder %s3977_s18, 0 }
   0xb   : > { %s4792_s20 = smov (%p40_p0, %s38_s20), 0  ;;  %p190_p4 = scmp.ne.s32.totalorder %s3961_s14, %s3957_s13 }
   0xc   : > { %4777 = sst [smem:[#allocation8_spill]] %s4792_s20  ;;  %p4078_p3 = por %p185_p2, %p184_p1 }
   0xd   : > { %s174_s23 = ssub.s32 %s3973_s17, %s4792_s20  ;;  %p191_p5 = scmp.eq.s32.totalorder %s3209_s19, 0 }
   0xe   : > { %p175_p6 = scmp.eq.s32.totalorder %s174_s23, 0  ;;  %p3619_p8 = scmp.lt.s32.totalorder %s3977_s18, 2 }
   0xf   : > { %p4085_p7 = por %p191_p5, %p190_p4  ;;  %s4094_s26 = sand.u32 1, %s3965_s15  }
  0x10   : > { %s4091_s25 = scalar_select %p175_p6, %s3965_s15, %s177_s21  }
  0x11   : > { %s3331_s27 = sshll.u32 %s3973_s17, 5  ;;  %s3214_s28 = sshll.u32 %s4094_s26, 1 }
  0x12   : > { %4780 = sst [smem:[#allocation9_spill]] %s4091_s25  ;;  %s394_s12 = scalar_lea.vmem [#allocation2], %s3214_s28 }
  0x13   : > { %s4781_s5 = sld [smem:[#allocation10_spill]]  ;;  %s402_s13 = sshll.u32 %s394_s12, 4  ;;  %s403_s13 = int_to_ptr.vmem [resolvable:$true] %s402_s13 }
  0x14   : > { %p4103_p9 = pnand %p3619_p8, %p4078_p3  ;;  %p3220_p10 = scmp.ge.s32.totalorder %s3977_s18, 1 }
  0x15   : > { %p450_p11 = scmp.lt.s32.totalorder %s3977_s18, 3  ;;  %s391_s21 = scalar_lea.sflag [#allocation3], %s4094_s26 }
  0x16   : > { %p3869_p12 = pneg %p4103_p9  ;;  %s3880_s23 = scalar_lea.vmem %s403_s13, 32 }
  0x17   : > { %p3881_p13 = scmp.ne.s32.totalorder %s403_s13, %s3880_s23 }
  0x19   : > { %s400_s11 = scalar_lea.hbm %s4781_s5, %s3331_s27  ;;  %p3883_p0 = pnand %p3881_p13, %p3869_p12 }
  0x1a   : > { %s3979_s27 = smov [#allocation2]  }
  0x1b   : > { %p3884_p1 = pneg %p3883_p0  ;;  %s3885_s22 = sshll.u32 %s3979_s27, 4  ;;  %s3886_s22 = int_to_ptr.vmem [resolvable:$false] %s3885_s22 }
  0x1c   : > { %s3887_s28 = scalar_lea.vmem %s3886_s22, 64  ;;  %p3888_p2 = scmp.lt.s32.totalorder %s403_s13, %s3886_s22 }
  0x1d   : > { %p3889_p3 = scmp.lt.s32.totalorder %s3887_s28, %s3880_s23 }
  0x1f   : > { %p3890_p4 = por %p3889_p3, %p3888_p2 }
  0x21   : > { %p3891_p5 = pnand %p3890_p4, %p3884_p1 }
  0x23   : > { %3894 = shalt.err (!%p3891_p5)
}
  0x24   : > { %3615 = dma.hbm_to_vmem [thread:$0]  (!%p4103_p9), %s400_s11, 32, %s403_s13, %s391_s21  }
  0x25   : > { %p4121_p6 = pnand %p3220_p10, %p450_p11  ;;  %s3217_s30 = sshll.u32 %s4094_s26, 6 }
  0x26   : > { %s3332_s12 = sshll.u32 %s3973_s17, 10  ;;  %s421_s28 = scalar_lea.vmem [#allocation4], %s3217_s30 }
  0x27   : > { %s427_s22 = scalar_lea.hbm %s4771_s7, %s3332_s12  ;;  %s428_s5 = sshll.u32 %s421_s28, 4  ;;  %s429_s5 = int_to_ptr.vmem [resolvable:$true] %s428_s5 }
  0x28   : > { %s418_s20 = scalar_lea.sflag [#allocation5], %s4094_s26  ;;  %s3908_s25 = scalar_lea.vmem %s429_s5, 1024 }
  0x29   : > { %p3909_p8 = scmp.ne.s32.totalorder %s429_s5, %s3908_s25  ;;  %s3980_s11 = smov [#allocation4]  }
  0x2a   : > { %s3913_s13 = sshll.u32 %s3980_s11, 4  ;;  %s3914_s13 = int_to_ptr.vmem [resolvable:$false] %s3913_s13 }
  0x2b   : > { %p3911_p13 = pnand %p3909_p8, %p3869_p12  ;;  %s3915_s21 = scalar_lea.vmem %s3914_s13, 2048 }
  0x2c   : > { %p3916_p10 = scmp.lt.s32.totalorder %s429_s5, %s3914_s13  ;;  %p3917_p11 = scmp.lt.s32.totalorder %s3915_s21, %s3908_s25 }
  0x2d   : > { %p3912_p0 = pneg %p3911_p13 }
  0x2e   : > { %p3918_p1 = por %p3917_p11, %p3916_p10 }
  0x30   : > { %p3919_p2 = pnand %p3918_p1, %p3912_p0 }
  0x32   : > { %3922 = shalt.err (!%p3919_p2)
}
  0x33   : > { %s3981_s12 = smov 64   ;;  %s3982_s30 = smov 4  }
  0x34   : > { %3618 = dma.hbm_to_vmem [thread:$0]  (!%p4103_p9), %s427_s22, 1024, %s429_s5, %s418_s20, %s3981_s12, %s3981_s12, %s3982_s30  }
  0x35   : > { %454 = sbr.rel (%p4121_p6) target bundleno = 2527 (0x9df), region = 60  ;;  %s456_s26 = sand.u32 (!%p4121_p6), 1, %s3961_s14  }
  0x36   : > { %s3221_s23 = sshll.u32 (!%p4121_p6), %s456_s26, 1  ;;  %s457_s27 = scalar_lea.sflag (!%p4121_p6), [#allocation3], %s456_s26 }
  0x37   : > { %s4139_s28 = scalar_lea.vmem (!%p4121_p6), [#allocation2], %s3221_s23 }
  0x3a   : > { %3948 = dma.done.wait (%p4085_p7), %s457_s27, 32  }
  0x3b   : > { %3950 = vsyncadd (%p4085_p7), %s457_s27, 4294967264  ;;  %s3222_s25 = sshll.u32 %s456_s26, 6  ;;  %s466_s11 = scalar_lea.sflag [#allocation5], %s456_s26 }
  0x3c   : > { %s4145_s19 = scalar_lea.vmem [#allocation4], %s3222_s25 }
  0x3d   : > { %3952 = dma.done.wait (%p4085_p7), %s466_s11, 1024  }
  0x3e   : > { %3954 = vsyncadd (%p4085_p7), %s466_s11, 4294966272  ;;  %p555_p9 = scmp.lt.s32.totalorder %s3969_s16, 1  ;;  %v3983_v0 = vmov 0   ;;  %v3984_v29 = vmov 0.0   ;;  %vm3985_vm0 = vmmov 0   ;;  %vm1555_vm1 = vcmask 1043456  }
  0x3f   : > { %838 = vmatprep.mubr.bf16.mxu0 %v3983_v0  ;;  %vm1447_vm2 = vcmask 64512   ;;  %vm2889_vm3 = vcmask 1041409   ;;  %vm2892_vm4 = vcmask 1042434   ;;  %vm2895_vm5 = vcmask 1043459  }
  0x40   : > { %s4794_s16 = smov (!%p555_p9, %s3969_s16), 1  ;;  %vm2898_vm6 = vcmask 1044484   ;;  %vm2901_vm7 = vcmask 1045509   ;;  %vm2904_vm8 = vcmask 1046534   ;;  %vm2907_vm9 = vcmask 1047559  }
  0x41   : > { %s3607_s5 = smul.u32 192, %s4794_s16  ;;  %s3333_s24 = sshll.u32 %s4794_s16, 5 }
  0x42   : > { %s4172_s12 = scalar_lea.vmem %s4764_s0, %s3333_s24  ;;  %s3337_s30 = sshll.u32 %s4794_s16, 4 }
  0x43   : > { %s4160_s22 = scalar_lea.vmem %s4766_s2, %s3607_s5  ;;  %v604_v8 = vld [vmem:[%s4172_s12] sm:$0xff]   ;;  %v4194_v25 = vld [vmem:[%s4172_s12 + $0x8] sm:$0xff]   ;;  %v4199_v27 = vld [vmem:[%s4172_s12 + $0x10] sm:$0xff]   ;;  %s4221_s27 = scalar_lea.vmem %s4773_s9, %s3337_s30 }
  0x44   : > { %v3674_v1 = vld [vmem:[%s4160_s22 + $0xac] ss:$12 sps:$4 sm:$0xff]   ;;  %v3676_v2 = vld [vmem:[%s4160_s22 + $0xa8] ss:$12 sps:$4 sm:$0xff]   ;;  %v3679_v4 = vld [vmem:[%s4160_s22 + $0x90] ss:$12 sps:$4 sm:$0xff]   ;;  %3459 = vmatprep.mubr.bf16.mxu1 %v604_v8 }
  0x45   : > { %806 = vmatprep.subr.bf16.mxu0 %v3674_v1  ;;  %v3677_v3 = vld [vmem:[%s4160_s22 + $0x94] ss:$12 sps:$4 sm:$0xff]   ;;  %v3680_v5 = vld [vmem:[%s4160_s22 + $0x7c] ss:$12 sps:$4 sm:$0xff]   ;;  %v3682_v6 = vld [vmem:[%s4160_s22 + $0x78] ss:$12 sps:$4 sm:$0xff]  }
  0x46   : > { %807 = vmatpush1.bf16.msra.mxu0 %v3676_v2  ;;  %v3683_v7 = vld [vmem:[%s4160_s22 + $0x64] ss:$12 sps:$4 sm:$0xff]   ;;  %v3685_v9 = vld [vmem:[%s4160_s22 + $0x60] ss:$12 sps:$4 sm:$0xff]   ;;  %v3688_v13 = vld [vmem:[%s4160_s22 + $0x48] ss:$12 sps:$4 sm:$0xff]  }
  0x47   : > { %808 = vmatprep.subr.bf16.mxu0 %v3677_v3  ;;  %v3686_v10 = vld [vmem:[%s4160_s22 + $0x4c] ss:$12 sps:$4 sm:$0xff]   ;;  %v3702_v11 = vld [vmem:[%s4160_s22 + $0xb0] ss:$12 sps:$4 sm:$0xff]   ;;  %v3689_v14 = vld [vmem:[%s4160_s22 + $0x34] ss:$12 sps:$4 sm:$0xff]  }
  0x48   : > { %v3703_v12 = vld [vmem:[%s4160_s22 + $0x98] ss:$12 sps:$4 sm:$0xff]   ;;  %3443 = vmatprep.subr.bf16.mxu1 %v3702_v11  ;;  %v3704_v15 = vld [vmem:[%s4160_s22 + $0x80] ss:$12 sps:$4 sm:$0xff]   ;;  %v3691_v16 = vld [vmem:[%s4160_s22 + $0x30] ss:$12 sps:$4 sm:$0xff]  }
  0x49   : > { %3444 = vmatpush3.bf16.msra.mxu1 %v3702_v11  ;;  %v3692_v17 = vld [vmem:[%s4160_s22 + $0x1c] ss:$12 sps:$4 sm:$0xff]   ;;  %v3694_v19 = vld [vmem:[%s4160_s22 + $0x18] ss:$12 sps:$4 sm:$0xff]   ;;  %v3697_v22 = vld [vmem:[%s4160_s22] ss:$12 sps:$4 sm:$0xff]  }
  0x4a   : > { %809 = vmatpush1.bf16.msra.mxu0 %v3679_v4  ;;  %3445 = vmatprep.subr.bf16.mxu1 %v3703_v12  ;;  %v3705_v18 = vld [vmem:[%s4160_s22 + $0x68] ss:$12 sps:$4 sm:$0xff]   ;;  %v3695_v20 = vld [vmem:[%s4160_s22 + $0x4] ss:$12 sps:$4 sm:$0xff]   ;;  %v3708_v24 = vld [vmem:[%s4160_s22 + $0x20] ss:$12 sps:$4 sm:$0xff]  }
  0x4b   : > { %810 = vmatprep.subr.bf16.mxu0 %v3680_v5  ;;  %v3706_v21 = vld [vmem:[%s4160_s22 + $0x50] ss:$12 sps:$4 sm:$0xff]   ;;  %v3707_v23 = vld [vmem:[%s4160_s22 + $0x38] ss:$12 sps:$4 sm:$0xff]   ;;  %v3709_v26 = vld [vmem:[%s4160_s22 + $0x8] ss:$12 sps:$4 sm:$0xff]  }
  0x4c   : > { %v4205_v28 = vld [vmem:[%s4172_s12 + $0x18] sm:$0xff]   ;;  %v4224_v31 = vld [vmem:[%s4221_s27 + $0x1] ss:$0 sm:$0xff]  ;;  %v4228_v35 = vld [vmem:[%s4221_s27] ss:$0 sm:$0xff]  ;;  %s3334_s5 = sshll.u32 %s4794_s16, 6 }
  0x4d   : > { %3446 = vmatpush3.bf16.msra.mxu1 %v3703_v12  ;;  %v4234_v42 = vld [vmem:[%s4221_s27 + $0x2] ss:$0 sm:$0xff]  ;;  %s4370_s22 = scalar_lea.vmem %s4767_s3, %s3334_s5  ;;  %s3335_s24 = sshll.u32 %s4794_s16, 7 }
  0x4e   : > { %811 = vmatpush1.bf16.msra.mxu0 %v3682_v6  ;;  %3447 = vmatprep.subr.bf16.mxu1 %v3704_v15  ;;  %s4433_s23 = scalar_lea.vmem %s4770_s6, %s3335_s24  ;;  %s3234_s25 = sshll.u32 %s4794_s16, 3 }
  0x4f   : > { %812 = vmatprep.subr.bf16.mxu0 %v3683_v7  ;;  %s602_s20 = scalar_lea.vmem %s4774_s10, %s3234_s25 }
  0x51   : > { %3448 = vmatpush3.bf16.msra.mxu1 %v3704_v15 }
  0x52   : > { %813 = vmatpush1.bf16.msra.mxu0 %v3685_v9  ;;  %3449 = vmatprep.subr.bf16.mxu1 %v3705_v18 }
  0x53   : > { %814 = vmatprep.subr.bf16.mxu0 %v3686_v10 }
  0x55   : > { %3450 = vmatpush3.bf16.msra.mxu1 %v3705_v18 }
  0x56   : > { %815 = vmatpush1.bf16.msra.mxu0 %v3688_v13  ;;  %3451 = vmatprep.subr.bf16.mxu1 %v3706_v21 }
  0x57   : > { %816 = vmatprep.subr.bf16.mxu0 %v3689_v14 }
  0x59   : > { %3452 = vmatpush3.bf16.msra.mxu1 %v3706_v21 }
  0x5a   : > { %817 = vmatpush1.bf16.msra.mxu0 %v3691_v16  ;;  %3453 = vmatprep.subr.bf16.mxu1 %v3707_v23 }
  0x5b   : > { %818 = vmatprep.subr.bf16.mxu0 %v3692_v17 }
  0x5d   : > { %3454 = vmatpush3.bf16.msra.mxu1 %v3707_v23 }
  0x5e   : > { %819 = vmatpush1.bf16.msra.mxu0 %v3694_v19  ;;  %3455 = vmatprep.subr.bf16.mxu1 %v3708_v24 }
  0x5f   : > { %820 = vmatprep.subr.bf16.mxu0 %v3695_v20 }
  0x61   : > { %3456 = vmatpush3.bf16.msra.mxu1 %v3708_v24 }
  0x62   : > { %821 = vmatpush1.bf16.msra.mxu0 %v3697_v22  ;;  %3457 = vmatprep.subr.bf16.mxu1 %v3709_v26 }
  0x63   : > { %3491 = vmatprep.subr.bf16.mxu0 %v3984_v29 }
  0x65   : > { %839 = vmatmul.mubr.bf16.vlgmr.msra.gmra.mxu0 %v604_v8  ;;  %3458 = vmatpush3.bf16.msra.mxu1 %v3709_v26 }
  0x66   : > { %848 = vmatprep.mubr.bf16.mxu0 %v3983_v0  ;;  %3467 = vmatprep.subr.bf16.mxu1 %v3984_v29 }
  0x68   : > { %3460 = vmatmul.mubr.bf16.vlgmr.msra.gmra.mxu1 %v4194_v25 }
  0x69   : > { %3463 = vmatprep.mubr.bf16.mxu1 %v4199_v27 }
  0x6d   : > { %849 = vmatmul.mubr.bf16.gmra.mxu0 %v4194_v25 }
  0x6e   : > { %858 = vmatprep.mubr.bf16.mxu0 %v3983_v0 }
  0x70   : > { %3464 = vmatmul.mubr.bf16.gmra.mxu1 %v4205_v28 }
  0x71   : > { %3469 = vmatprep.mubr.msk.bf16.mxu1 %vm3985_vm0, %v3984_v29 }
  0x75   : > { %859 = vmatmul.mubr.bf16.gmra.mxu0 %v4199_v27 }
  0x76   : > { %868 = vmatprep.mubr.bf16.mxu0 %v3983_v0 }
  0x7d   : > { %869 = vmatmul.mubr.bf16.gmra.mxu0 %v4205_v28 }
  0x7e   : > { %3493 = vmatprep.mubr.msk.bf16.mxu0 %vm3985_vm0, %v3984_v29 }
 0x125   : > { %v840_v30 = vpop.f32.mrf.mxu0 }
 0x126   : > { %v948_v38 = vadd.f32 %v4228_v35, %v840_v30 }
 0x127   : > { %v842_v32 = vpop.f32.mrf.mxu0 }
 0x128   : > { %v960_v33 = vadd.f32 %v4224_v31, %v842_v32  ;;  %v980_v43 = vpack.c.bf16 %v948_v38, %v948_v38  ;;  %v3461_v45 = vpop.f32.mrf.mxu1 }
 0x129   : > { %v844_v34 = vpop.f32.mrf.mxu0  ;;  %v974_v47 = vadd.f32 %v3461_v45, %v4234_v42 }
 0x12a   : > { %v988_v36 = vpack.c.bf16 %v960_v33, %v960_v33  ;;  %v913_v49 = vpop.f32.mrf.mxu1  ;;  %v949_v51 = vadd.f32 %v4228_v35, %v844_v34 }
 0x12b   : > { %v846_v37 = vpop.f32.mrf.mxu0  ;;  %v1546_v50 = vpack.c.bf16 %v974_v47, %v974_v47  ;;  %v972_v32 = vadd.f32 %v4234_v42, %v913_v49 }
 0x12c   : > { %3468 = vmatpush3.bf16.xpose.msra.mxu1 %v988_v36  ;;  %v961_v40 = vadd.f32 %v4224_v31, %v846_v37  ;;  %v3462_v53 = vpop.f32.mrf.mxu1  ;;  %v981_v61 = vpack.c.bf16 %v949_v51, %v949_v51 }
 0x12d   : > { %v850_v39 = vpop.f32.mrf.mxu0  ;;  %3473 = vmatprep.subr.bf16.mxu1 %v3984_v29  ;;  %v4245_v55 = vsel %vm1555_vm1, %v1546_v50, 0  ;;  %v975_v56 = vadd.f32 %v3462_v53, %v4234_v42 }
 0x12e   : > { %v989_v46 = vpack.c.bf16 %v961_v40, %v961_v40  ;;  %v4248_v58 = vpop.f32.mrf.mxu1  ;;  %v950_v9 = vadd.f32 %v4228_v35, %v850_v39  ;;  %v1544_v40 = vpack.c.bf16 %v972_v32, %v972_v32 }
 0x12f   : > { %v852_v41 = vpop.f32.mrf.mxu0  ;;  %v1547_v60 = vpack.c.bf16 %v975_v56, %v975_v56  ;;  %v973_v51 = vadd.f32 %v4234_v42, %v4248_v58  ;;  %v1330_v58 = vlaneseq }
 0x130   : > { %v962_v54 = vadd.f32 %v4224_v31, %v852_v41  ;;  %v3465_v63 = vpop.f32.mrf.mxu1  ;;  %v982_v23 = vpack.c.bf16 %v950_v9, %v950_v9 }
 0x131   : > { %v4236_v44 = vpop.f32.mrf.mxu0  ;;  %v4252_v3 = vsel %vm1555_vm1, %v1547_v60, 0  ;;  %v978_v6 = vadd.f32 %v3465_v63, %v4234_v42  ;;  %v4308_v60 = vshrl.u32 %v1330_v58, 7 }
 0x132   : > { %v990_v1 = vpack.c.bf16 %v962_v54, %v962_v54  ;;  %v929_v7 = vpop.f32.mrf.mxu1  ;;  %v951_v37 = vadd.f32 %v4228_v35, %v4236_v44  ;;  %v1545_v54 = vpack.c.bf16 %v973_v51, %v973_v51 }
 0x133   : > { %v856_v48 = vpop.f32.mrf.mxu0  ;;  %3470 = vmatmul.mubr.bf16.vlgmr.msra.gmra.mxu1 %v980_v43  ;;  %v976_v8 = vadd.f32 %v4234_v42, %v929_v7  ;;  %v1550_v11 = vpack.c.bf16 %v978_v6, %v978_v6 }
 0x134   : > { %3474 = vmatpush3.bf16.xpose.msra.mxu1 %v989_v46  ;;  %3475 = vmatprep.mubr.msk.bf16.mxu1 %vm3985_vm0, %v3984_v29  ;;  %v3466_v12 = vpop.f32.mrf.mxu1  ;;  %v963_v13 = vadd.f32 %v4224_v31, %v856_v48  ;;  %v983_v45 = vpack.c.bf16 %v951_v37, %v951_v37  ;;  %v1557_v46 = vsel %vm1555_vm1, %v1544_v40, 0  ;;  %v1603_v56 = vsel %vm1555_vm1, %v1545_v54, 0 }
 0x135   : > { %v860_v52 = vpop.f32.mrf.mxu0  ;;  %3479 = vmatprep.subr.bf16.mxu1 %v3984_v29  ;;  %v1548_v14 = vpack.c.bf16 %v976_v8, %v976_v8  ;;  %v979_v15 = vadd.f32 %v3466_v12, %v4234_v42  ;;  %v4265_v18 = vsel %vm1555_vm1, %v1550_v11, 0 }
 0x136   : > { %v952_v4 = vadd.f32 %v4228_v35, %v860_v52  ;;  %v932_v19 = vpop.f32.mrf.mxu1  ;;  %v991_v26 = vpack.c.bf16 %v963_v13, %v963_v13 }
 0x137   : > { %v862_v57 = vpop.f32.mrf.mxu0  ;;  %v4269_v21 = vsel %vm1555_vm1, %v1548_v14, 0  ;;  %v1551_v22 = vpack.c.bf16 %v979_v15, %v979_v15  ;;  %v977_v24 = vadd.f32 %v4234_v42, %v932_v19  ;;  %v3986_v42 = vmov 1966171168  }
 0x138   : > { %v964_v59 = vadd.f32 %v4224_v31, %v862_v57  ;;  %v984_v16 = vpack.c.bf16 %v952_v4, %v952_v4  ;;  %v1328_v57 = vunpack.c.l.s4 %v3986_v42  ;;  %v4315_v4 = vsub.s32 0, %v4308_v60 }
 0x139   : > { %v864_v62 = vpop.f32.mrf.mxu0  ;;  %v4274_v33 = vsel %vm1555_vm1, %v1551_v22, 0  ;;  %v1549_v36 = vpack.c.bf16 %v977_v24, %v977_v24 }
 0x13a   : > { %v992_v2 = vpack.c.bf16 %v964_v59, %v964_v59  ;;  %v953_v48 = vadd.f32 %v4228_v35, %v864_v62  ;;  %v1329_v59 = vunpack.c.0.s8 %v1328_v57 }
 0x13b   : > { %v866_v5 = vpop.f32.mrf.mxu0  ;;  %3476 = vmatmul.mubr.bf16.vlgmr.msra.gmra.mxu1 %v981_v61  ;;  %v4284_v38 = vsel %vm1555_vm1, %v1549_v36, 0 }
 0x13c   : > { %3480 = vmatpush3.bf16.xpose.msra.mxu1 %v990_v1  ;;  %3492 = vmatpush3.bf16.xpose.msra.mxu0 %v992_v2  ;;  %v965_v39 = vadd.f32 %v4224_v31, %v866_v5  ;;  %v985_v50 = vpack.c.bf16 %v953_v48, %v953_v48  ;;  %v1332_v62 = vsub.s32 %v1329_v59, %v4308_v60 }
 0x13d   : > { %v870_v10 = vpop.f32.mrf.mxu0  ;;  %3481 = vmatprep.mubr.msk.bf16.mxu1 %vm3985_vm0, %v3984_v29  ;;  %3485 = vmatprep.subr.bf16.mxu1 %v3984_v29 }
 0x13e   : > { %3503 = vmatprep.subr.bf16.mxu0 %v3984_v29  ;;  %v954_v34 = vadd.f32 %v4228_v35, %v870_v10  ;;  %v993_v44 = vpack.c.bf16 %v965_v39, %v965_v39 }
 0x13f   : > { %v872_v17 = vpop.f32.mrf.mxu0 }
 0x140   : > { %v966_v20 = vadd.f32 %v4224_v31, %v872_v17  ;;  %v986_v41 = vpack.c.bf16 %v954_v34, %v954_v34 }
 0x141   : > { %v874_v43 = vpop.f32.mrf.mxu0 }
 0x142   : > { %v994_v30 = vpack.c.bf16 %v966_v20, %v966_v20  ;;  %v955_v53 = vadd.f32 %v4228_v35, %v874_v43  ;;  %v612_v35 = vld [vmem:[%s4765_s1] sm:$0xff] }
 0x143   : > { %3482 = vmatmul.mubr.bf16.vlgmr.msra.gmra.mxu1 %v982_v23  ;;  %3494 = vmatmul.mubr.bf16.vlgmr.msra.gmra.mxu0 %v984_v16  ;;  %v876_v47 = vpop.f32.mrf.mxu0  ;;  %v1324_v61 = vsub.f32 1.0, %v612_v35 }
 0x144   : > { %3486 = vmatpush3.bf16.xpose.msra.mxu1 %v991_v26  ;;  %3504 = vmatpush3.bf16.xpose.msra.mxu0 %v994_v30  ;;  %v967_v49 = vadd.f32 %v4224_v31, %v876_v47  ;;  %v987_v31 = vpack.c.bf16 %v955_v53, %v955_v53 }
 0x145   : > { %3487 = vmatprep.mubr.msk.bf16.mxu1 %vm3985_vm0, %v3984_v29  ;;  %3505 = vmatprep.mubr.msk.bf16.mxu0 %vm3985_vm0, %v3984_v29  ;;  %v1333_v63 = vrot.slane %v1324_v61, %v1332_v62  ;;  %v1326_v8 = vcombine.high %v1324_v61, %v1324_v61 }
 0x146   : > { %3497 = vmatprep.subr.bf16.mxu1 %v3984_v29  ;;  %3515 = vmatprep.subr.bf16.mxu0 %v3984_v29  ;;  %v995_v52 = vpack.c.bf16 %v967_v49, %v967_v49 }
 0x147   : > { %v1349_v1 = vrot.slane %v1333_v63, %v1332_v62  ;;  %v1341_v5 = vcombine.high %v1333_v63, %v1333_v63  ;;  %v1340_v14 = vrot.slane %v1326_v8, %v1332_v62 }
 0x149   : > { %v1383_v2 = vmul.f32 -1e+09, %v1349_v1  ;;  %v1363_v7 = vrot.slane %v1341_v5, %v1332_v62  ;;  %v1371_v20 = vcombine.high %v1349_v1, %v1349_v1  ;;  %v1356_v22 = vrot.slane %v1340_v14, %v1332_v62 }
 0x14b   : > { %3488 = vmatmul.mubr.bf16.vlgmr.msra.gmra.mxu1 %v983_v45  ;;  %3506 = vmatmul.mubr.bf16.vlgmr.msra.gmra.mxu0 %v986_v41  ;;  %v1402_v6 = vrot.slane %v1383_v2, %v4315_v4  ;;  %v1384_v13 = vmul.f32 -1e+09, %v1363_v7  ;;  %v1385_v32 = vmul.f32 -1e+09, %v1371_v20  ;;  %v1387_v34 = vmul.f32 -1e+09, %v1356_v22 }
 0x14c   : > { %3498 = vmatpush3.bf16.xpose.msra.mxu1 %v993_v44  ;;  %3499 = vmatprep.mubr.msk.bf16.mxu1 %vm3985_vm0, %v3984_v29  ;;  %v1373_v40 = vcombine.high %v1363_v7, %v1363_v7  ;;  %v1372_v45 = vcombine.high %v1356_v22, %v1356_v22 }
 0x14d   : > { %3509 = vmatprep.subr.bf16.mxu1 %v3984_v29  ;;  %3516 = vmatpush3.bf16.msra.mxu0 %v1557_v46  ;;  %v1406_v19 = vrot.slane %v1384_v13, %v4315_v4  ;;  %v1410_v41 = vrot.slane %v1385_v32, %v4315_v4  ;;  %v1418_v43 = vrot.slane %v1387_v34, %v4315_v4 }
 0x14e   : > { %3517 = vmatprep.mubr.msk.bf16.mxu0 %vm3985_vm0, %v3984_v29  ;;  %3527 = vmatprep.subr.bf16.mxu0 %v3984_v29  ;;  %v1386_v51 = vmul.f32 -1e+09, %v1373_v40  ;;  %v1389_v54 = vmul.f32 -1e+09, %v1372_v45 }
 0x150   : > { %v1414_v61 = vrot.slane %v1386_v51, %v4315_v4  ;;  %v1426_v63 = vrot.slane %v1389_v54, %v4315_v4 }
 0x153   : > { %3500 = vmatmul.mubr.bf16.vlgmr.msra.gmra.mxu1 %v985_v50 }
 0x154   : > { %3510 = vmatpush3.bf16.xpose.msra.mxu1 %v995_v52  ;;  %3511 = vmatprep.mubr.msk.bf16.mxu1 %vm3985_vm0, %v3984_v29 }
 0x155   : > { %3521 = vmatprep.subr.bf16.mxu1 %v3984_v29 }
 0x15b   : > { %3512 = vmatmul.mubr.bf16.vlgmr.msra.gmra.mxu1 %v987_v31  ;;  %v1342_v31 = vcombine.high %v1340_v14, %v1340_v14 }
 0x15c   : > { %3522 = vmatpush3.bf16.msra.mxu1 %v1603_v56  ;;  %3523 = vmatprep.mubr.msk.bf16.mxu1 %vm3985_vm0, %v3984_v29 }
 0x15d   : > { %3533 = vmatprep.subr.bf16.mxu1 %v3984_v29  ;;  %v1370_v1 = vrot.slane %v1342_v31, %v1332_v62 }
 0x15f   : > { %v1388_v13 = vmul.f32 -1e+09, %v1370_v1  ;;  %v1374_v22 = vcombine.high %v1370_v1, %v1370_v1 }
 0x161   : > { %v1422_v62 = vrot.slane %v1388_v13, %v4315_v4  ;;  %v1390_v34 = vmul.f32 -1e+09, %v1374_v22 }
 0x163   : > { %v1430_v40 = vrot.slane %v1390_v34, %v4315_v4 }
 0x1f3   : > { %v1030_v9 = vpop.f32.mrf.mxu1 }
 0x1f4   : > { %v1316_v10 = vmul.f32 0.088388346, %v1030_v9 }
 0x1f5   : > { %v3471_v11 = vpop.f32.mrf.mxu1 }
 0x1f6   : > { %v4318_v12 = vadd.f32 %v1402_v6, %v1316_v10 }
 0x1f7   : > { %v1033_v15 = vpop.f32.mrf.mxu1 }
 0x1f8   : > { %v1448_v16 = vsel %vm1447_vm2, %v4318_v12, -inf }
 0x1f9   : > { %1449 = vmax.xlane.f32.xlu0 %v1448_v16  ;;  %v3472_v17 = vpop.f32.mrf.mxu1 }
 0x1fb   : > { %v1070_v23 = vpop.f32.mrf.mxu1 }
 0x1fc   : > { %v1317_v24 = vmul.f32 0.088388346, %v1070_v23 }
 0x1fd   : > { %v3477_v26 = vpop.f32.mrf.mxu1 }
 0x1fe   : > { %v4323_v30 = vadd.f32 %v1406_v19, %v1317_v24 }
 0x1ff   : > { %v1073_v36 = vpop.f32.mrf.mxu1 }
 0x200   : > { %v1451_v37 = vsel %vm1447_vm2, %v4323_v30, -inf }
 0x201   : > { %1452 = vmax.xlane.f32.xlu0 %v1451_v37  ;;  %v3478_v39 = vpop.f32.mrf.mxu1 }
 0x203   : > { %v1110_v44 = vpop.f32.mrf.mxu1  ;;  %v1190_v46 = vpop.f32.mrf.mxu0 }
 0x204   : > { %v1318_v47 = vmul.f32 0.088388346, %v1110_v44  ;;  %v1320_v48 = vmul.f32 0.088388346, %v1190_v46 }
 0x205   : > { %v3483_v49 = vpop.f32.mrf.mxu1  ;;  %v3495_v50 = vpop.f32.mrf.mxu0 }
 0x206   : > { %v4329_v52 = vadd.f32 %v1410_v41, %v1318_v47  ;;  %v4331_v53 = vadd.f32 %v1418_v43, %v1320_v48 }
 0x207   : > { %v1113_v56 = vpop.f32.mrf.mxu1  ;;  %v1193_v42 = vpop.f32.mrf.mxu0 }
 0x208   : > { %v1454_v57 = vsel %vm1447_vm2, %v4329_v52, -inf  ;;  %v1460_v58 = vsel %vm1447_vm2, %v4331_v53, -inf }
 0x209   : > { %1455 = vmax.xlane.f32.xlu1 %v1454_v57  ;;  %v3484_v59 = vpop.f32.mrf.mxu1  ;;  %1461 = vmax.xlane.f32.xlu0 %v1460_v58  ;;  %v3496_v35 = vpop.f32.mrf.mxu0 }
 0x20b   : > { %v1150_v2 = vpop.f32.mrf.mxu1  ;;  %v1270_v5 = vpop.f32.mrf.mxu0 }
 0x20c   : > { %v1319_v6 = vmul.f32 0.088388346, %v1150_v2  ;;  %v1322_v7 = vmul.f32 0.088388346, %v1270_v5 }
 0x20d   : > { %v3489_v8 = vpop.f32.mrf.mxu1  ;;  %v3507_v9 = vpop.f32.mrf.mxu0 }
 0x20e   : > { %v1442_v10 = vadd.f32 %v1414_v61, %v1319_v6  ;;  %v1445_v11 = vadd.f32 %v1426_v63, %v1322_v7 }
 0x20f   : > { %v1153_v14 = vpop.f32.mrf.mxu1  ;;  %v1273_v15 = vpop.f32.mrf.mxu0 }
 0x210   : > { %v1457_v16 = vsel %vm1447_vm2, %v1442_v10, -inf  ;;  %v1466_v17 = vsel %vm1447_vm2, %v1445_v11, -inf }
 0x211   : > { %1458 = vmax.xlane.f32.xlu1 %v1457_v16  ;;  %v3490_v19 = vpop.f32.mrf.mxu1  ;;  %1467 = vmax.xlane.f32.xlu0 %v1466_v17  ;;  %v3508_v20 = vpop.f32.mrf.mxu0 }
 0x213   : > { %v1230_v23 = vpop.f32.mrf.mxu1 }
 0x214   : > { %v1321_v24 = vmul.f32 0.088388346, %v1230_v23 }
 0x215   : > { %v3501_v26 = vpop.f32.mrf.mxu1 }
 0x216   : > { %v1444_v32 = vadd.f32 %v1422_v62, %v1321_v24 }
 0x217   : > { %v1233_v36 = vpop.f32.mrf.mxu1 }
 0x218   : > { %v1463_v37 = vsel %vm1447_vm2, %v1444_v32, -inf }
 0x219   : > { %1464 = vmax.xlane.f32.xlu1 %v1463_v37  ;;  %v3502_v39 = vpop.f32.mrf.mxu1 }
 0x21b   : > { %v1310_v41 = vpop.f32.mrf.mxu1 }
 0x21c   : > { %v1323_v43 = vmul.f32 0.088388346, %v1310_v41 }
 0x21d   : > { %v3513_v45 = vpop.f32.mrf.mxu1 }
 0x21e   : > { %v1446_v44 = vadd.f32 %v1430_v40, %v1323_v43 }
 0x21f   : > { %v1313_v46 = vpop.f32.mrf.mxu1 }
 0x220   : > { %v1469_v47 = vsel %vm1447_vm2, %v1446_v44, -inf }
 0x221   : > { %1470 = vmax.xlane.f32.xlu1 %v1469_v47  ;;  %v3514_v48 = vpop.f32.mrf.mxu1 }
 0x282   : > { %v1450_v49 = vpop.xlane.xlu0 %1449 }
 0x283   : > { %v1472_v50 = vsub.f32 %v4318_v12, %v1450_v49 }
 0x285   : > { %v1480_v51 = vmul.f32 1.442695, %v1472_v50 }
 0x287   : > { %3770 = vpow2.f32 %v1480_v51 }
 0x28a   : > { %v1453_v54 = vpop.xlane.xlu0 %1452 }
 0x28b   : > { %v1473_v31 = vsub.f32 %v4323_v30, %v1453_v54 }
 0x28d   : > { %v1482_v56 = vmul.f32 1.442695, %v1473_v31 }
 0x28f   : > { %3772 = vpow2.f32 %v1482_v56 }
 0x292   : > { %v1456_v42 = vpop.xlane.xlu1 %1455  ;;  %v1462_v57 = vpop.xlane.xlu0 %1461 }
 0x293   : > { %v1474_v58 = vsub.f32 %v4329_v52, %v1456_v42  ;;  %v1476_v59 = vsub.f32 %v4331_v53, %v1462_v57 }
 0x294   : > { %v3771_v35 = vpop.eup %3770 }
 0x295   : > { %v1484_v61 = vmul.f32 1.442695, %v1474_v58  ;;  %v1488_v63 = vmul.f32 1.442695, %v1476_v59  ;;  %v1496_v1 = vsel %vm1447_vm2, %v3771_v35, 0.0 }
 0x296   : > { %1497 = vadd.xlane.f32.xlu0 %v1496_v1 }
 0x297   : > { %3774 = vpow2.f32 %v1484_v61  ;;  %v3710_v61 = vld [vmem:[%s4370_s22 + $0x38] sm:$0xff]  }
 0x298   : > { %3776 = vpow2.f32 %v1488_v63 }
 0x29a   : > { %v1459_v12 = vpop.xlane.xlu1 %1458  ;;  %v1468_v2 = vpop.xlane.xlu0 %1467 }
 0x29b   : > { %v1475_v5 = vsub.f32 %v1442_v10, %v1459_v12  ;;  %v1478_v30 = vsub.f32 %v1445_v11, %v1468_v2 }
 0x29c   : > { %v3773_v6 = vpop.eup %3772 }
 0x29d   : > { %v1486_v7 = vmul.f32 1.442695, %v1475_v5  ;;  %v1492_v8 = vmul.f32 1.442695, %v1478_v30  ;;  %v1499_v9 = vsel %vm1447_vm2, %v3773_v6, 0.0 }
 0x29e   : > { %1500 = vadd.xlane.f32.xlu1 %v1499_v9  ;;  %v3716_v9 = vld [vmem:[%s4370_s22 + $0x8] sm:$0xff]  }
 0x29f   : > { %3778 = vpow2.f32 %v1486_v7  ;;  %v3714_v7 = vld [vmem:[%s4370_s22 + $0x18] sm:$0xff]  }
 0x2a0   : > { %3780 = vpow2.f32 %v1492_v8  ;;  %v3715_v8 = vld [vmem:[%s4370_s22 + $0x10] sm:$0xff]  }
 0x2a2   : > { %v1465_v52 = vpop.xlane.xlu1 %1464 }
 0x2a3   : > { %v1477_v53 = vsub.f32 %v1444_v32, %v1465_v52  ;;  %v3717_v52 = vld [vmem:[%s4370_s22] sm:$0xff]  }
 0x2a4   : > { %v3775_v13 = vpop.eup %3774 }
 0x2a5   : > { %v1490_v14 = vmul.f32 1.442695, %v1477_v53  ;;  %v1502_v15 = vsel %vm1447_vm2, %v3775_v13, 0.0  ;;  %v3777_v16 = vpop.eup %3776 }
 0x2a6   : > { %1503 = vadd.xlane.f32.xlu0 %v1502_v15  ;;  %v1508_v10 = vsel %vm1447_vm2, %v3777_v16, 0.0 }
 0x2a7   : > { %3782 = vpow2.f32 %v1490_v14 }
 0x2aa   : > { %1509 = vadd.xlane.f32.xlu0 %v1508_v10  ;;  %v1471_v11 = vpop.xlane.xlu1 %1470 }
 0x2ab   : > { %v1479_v17 = vsub.f32 %v1446_v44, %v1471_v11 }
 0x2ac   : > { %v3779_v19 = vpop.eup %3778 }
 0x2ad   : > { %v4353_v20 = vpop.eup %3780  ;;  %v1494_v62 = vmul.f32 1.442695, %v1479_v17  ;;  %v1505_v22 = vsel %vm1447_vm2, %v3779_v19, 0.0 }
 0x2ae   : > { %v1514_v23 = vsel %vm1447_vm2, %v4353_v20, 0.0  ;;  %1506 = vadd.xlane.f32.xlu1 %v1505_v22 }
 0x2af   : > { %3784 = vpow2.f32 %v1494_v62  ;;  %1515 = vadd.xlane.f32.xlu0 %v1514_v23 }
 0x2b4   : > { %v4358_v24 = vpop.eup %3782 }
 0x2b5   : > { %v1511_v26 = vsel %vm1447_vm2, %v4358_v24, 0.0 }
 0x2b6   : > { %1512 = vadd.xlane.f32.xlu1 %v1511_v26 }
 0x2bc   : > { %v4362_v32 = vpop.eup %3784 }
 0x2bd   : > { %v1517_v34 = vsel %vm1447_vm2, %v4362_v32, 0.0 }
 0x2be   : > { %1518 = vadd.xlane.f32.xlu1 %v1517_v34 }
 0x31f   : > { %v1498_v36 = vpop.xlane.xlu0 %1497 }
 0x320   : > { %3786 = vrcp.f32 %v1498_v36 }
 0x327   : > { %v1501_v37 = vpop.xlane.xlu1 %1500 }
 0x328   : > { %3788 = vrcp.f32 %v1501_v37 }
 0x32d   : > { %v3787_v39 = vpop.eup %3786 }
 0x32e   : > { %v1528_v40 = vmul.f32 %v3787_v39, %v3771_v35 }
 0x32f   : > { %v1504_v41 = vpop.xlane.xlu0 %1503 }
 0x330   : > { %3790 = vrcp.f32 %v1504_v41  ;;  %v1536_v43 = vpack.c.bf16 %v1528_v40, %v1528_v40 }
 0x332   : > { %3518 = vmatmul.mubr.msk.bf16.vlgmr.msra.gmra.mxu0 %vm1447_vm2, %v1536_v43 }
 0x333   : > { %3528 = vmatpush3.bf16.msra.mxu0 %v4245_v55  ;;  %v1510_v45 = vpop.xlane.xlu0 %1509  ;;  %3529 = vmatprep.mubr.msk.bf16.mxu0 %vm3985_vm0, %v3984_v29 }
 0x334   : > { %3792 = vrcp.f32 %v1510_v45  ;;  %3539 = vmatprep.subr.bf16.mxu0 %v3984_v29 }
 0x335   : > { %v3789_v44 = vpop.eup %3788 }
 0x336   : > { %v1529_v46 = vmul.f32 %v3789_v44, %v3773_v6  ;;  %v3712_v6 = vld [vmem:[%s4370_s22 + $0x28] sm:$0xff]  }
 0x337   : > { %v1507_v47 = vpop.xlane.xlu1 %1506 }
 0x338   : > { %3794 = vrcp.f32 %v1507_v47  ;;  %v1537_v48 = vpack.c.bf16 %v1529_v46, %v1529_v46  ;;  %v1516_v49 = vpop.xlane.xlu0 %1515 }
 0x339   : > { %3796 = vrcp.f32 %v1516_v49 }
 0x33a   : > { %3524 = vmatmul.mubr.msk.bf16.vlgmr.msra.gmra.mxu1 %vm1447_vm2, %v1537_v48 }
 0x33b   : > { %3534 = vmatpush3.bf16.msra.mxu1 %v4252_v3  ;;  %3535 = vmatprep.mubr.msk.bf16.mxu1 %vm3985_vm0, %v3984_v29 }
 0x33c   : > { %3545 = vmatprep.subr.bf16.mxu1 %v3984_v29 }
 0x33d   : > { %v3791_v55 = vpop.eup %3790 }
 0x33e   : > { %v1530_v50 = vmul.f32 %v3791_v55, %v3775_v13 }
 0x33f   : > { %v1513_v51 = vpop.xlane.xlu1 %1512 }
 0x340   : > { %3798 = vrcp.f32 %v1513_v51  ;;  %v1538_v54 = vpack.c.bf16 %v1530_v50, %v1530_v50 }
 0x341   : > { %v3793_v31 = vpop.eup %3792 }
 0x342   : > { %3530 = vmatmul.mubr.msk.bf16.vlgmr.msra.gmra.mxu0 %vm1447_vm2, %v1538_v54  ;;  %v1532_v3 = vmul.f32 %v3793_v31, %v3777_v16 }
 0x343   : > { %3540 = vmatpush3.bf16.msra.mxu0 %v4269_v21  ;;  %3541 = vmatprep.mubr.msk.bf16.mxu0 %vm3985_vm0, %v3984_v29 }
 0x344   : > { %3551 = vmatprep.subr.bf16.mxu0 %v3984_v29  ;;  %v1540_v59 = vpack.c.bf16 %v1532_v3, %v1532_v3 }
 0x345   : > { %v3795_v56 = vpop.eup %3794 }
 0x346   : > { %v1531_v42 = vmul.f32 %v3795_v56, %v3779_v19  ;;  %v3797_v35 = vpop.eup %3796 }
 0x347   : > { %v1519_v57 = vpop.xlane.xlu1 %1518  ;;  %v1534_v21 = vmul.f32 %v3797_v35, %v4353_v20 }
 0x348   : > { %3800 = vrcp.f32 %v1519_v57  ;;  %v1539_v58 = vpack.c.bf16 %v1531_v42, %v1531_v42  ;;  %v3866_v57 = vld [vmem:[%s4172_s12] sm:$0xff]   ;;  %s4426_s12 = scalar_lea.vmem %s4768_s4, %s3335_s24 }
 0x349   : > { %v1542_v2 = vpack.c.bf16 %v1534_v21, %v1534_v21 }
 0x34a   : > { %3536 = vmatmul.mubr.msk.bf16.vlgmr.msra.gmra.mxu1 %vm1447_vm2, %v1539_v58  ;;  %3542 = vmatmul.mubr.msk.bf16.vlgmr.msra.gmra.mxu0 %vm1447_vm2, %v1540_v59  ;;  %v2058_v58 = vunpack.c.l.bf16 %v3866_v57  ;;  %v3274_v59 = vld [vmem:[%s4221_s27 + $0x3] ss:$0 sm:$0xff] }
 0x34b   : > { %3546 = vmatpush3.bf16.msra.mxu1 %v4284_v38  ;;  %3552 = vmatpush3.bf16.msra.mxu0 %v4265_v18  ;;  %v3711_v38 = vld [vmem:[%s4370_s22 + $0x30] sm:$0xff]  }
 0x34c   : > { %3547 = vmatprep.mubr.msk.bf16.mxu1 %vm3985_vm0, %v3984_v29  ;;  %3553 = vmatprep.mubr.msk.bf16.mxu0 %vm3985_vm0, %v3984_v29 }
 0x34d   : > { %v3799_v63 = vpop.eup %3798  ;;  %3557 = vmatprep.subr.bf16.mxu1 %v3984_v29  ;;  %3563 = vmatprep.subr.bf16.mxu0 %v3710_v61 }
 0x34e   : > { %v1533_v1 = vmul.f32 %v3799_v63, %v4358_v24 }
 0x350   : > { %v1541_v12 = vpack.c.bf16 %v1533_v1, %v1533_v1 }
 0x352   : > { %3548 = vmatmul.mubr.msk.bf16.vlgmr.msra.gmra.mxu1 %vm1447_vm2, %v1541_v12  ;;  %3554 = vmatmul.mubr.msk.bf16.vlgmr.msra.gmra.mxu0 %vm1447_vm2, %v1542_v2  ;;  %v2059_v12 = vunpack.c.h.bf16 %v3866_v57  ;;  %v2060_v2 = vunpack.c.l.bf16 %v4194_v25 }
 0x353   : > { %3558 = vmatpush3.bf16.msra.mxu1 %v4274_v33  ;;  %3559 = vmatprep.mubr.msk.bf16.mxu1 %vm3985_vm0, %v3984_v29  ;;  %v3713_v33 = vld [vmem:[%s4370_s22 + $0x20] sm:$0xff]  }
 0x354   : > { %3564 = vmatpush3.bf16.msra.mxu0 %v3710_v61 }
 0x355   : > { %v3801_v18 = vpop.eup %3800  ;;  %3565 = vmatprep.subr.bf16.mxu0 %v3711_v38 }
 0x356   : > { %v1535_v5 = vmul.f32 %v3801_v18, %v4362_v32 }
 0x358   : > { %v1543_v30 = vpack.c.bf16 %v1535_v5, %v1535_v5  ;;  %3566 = vmatpush3.bf16.msra.mxu0 %v3711_v38 }
 0x359   : > { %3567 = vmatprep.subr.bf16.mxu0 %v3712_v6 }
 0x35a   : > { %3560 = vmatmul.mubr.msk.bf16.vlgmr.msra.gmra.mxu1 %vm1447_vm2, %v1543_v30 }
 0x35b   : > { %2331 = vmatprep.mubr.bf16.mxu1 %v3983_v0 }
 0x35c   : > { %3568 = vmatpush3.bf16.msra.mxu0 %v3712_v6 }
 0x35d   : > { %3569 = vmatprep.subr.bf16.mxu0 %v3713_v33 }
 0x360   : > { %3570 = vmatpush3.bf16.msra.mxu0 %v3713_v33  ;;  %v2061_v33 = vunpack.c.h.bf16 %v4194_v25 }
 0x361   : > { %3571 = vmatprep.subr.bf16.mxu0 %v3714_v7 }
 0x364   : > { %3572 = vmatpush3.bf16.msra.mxu0 %v3714_v7 }
 0x365   : > { %3573 = vmatprep.subr.bf16.mxu0 %v3715_v8 }
 0x368   : > { %3574 = vmatpush3.bf16.msra.mxu0 %v3715_v8 }
 0x369   : > { %3575 = vmatprep.subr.bf16.mxu0 %v3716_v9 }
 0x36c   : > { %3576 = vmatpush3.bf16.msra.mxu0 %v3716_v9  ;;  %v2062_v9 = vunpack.c.l.bf16 %v4199_v27 }
 0x36d   : > { %3577 = vmatprep.subr.bf16.mxu0 %v3717_v52 }
 0x370   : > { %3578 = vmatpush3.bf16.msra.mxu0 %v3717_v52 }
 0x3f2   : > { %v1593_v53 = vpop.f32.mrf.mxu0 }
 0x3f4   : > { %v3519_v13 = vpop.f32.mrf.mxu0 }
 0x3f6   : > { %v1596_v14 = vpop.f32.mrf.mxu0 }
 0x3f8   : > { %v3520_v15 = vpop.f32.mrf.mxu0 }
 0x3fa   : > { %v1639_v16 = vpop.f32.mrf.mxu1 }
 0x3fb   : > { %v1921_v10 = vpack.c.bf16 %v1639_v16, %v1593_v53  ;;  %v2063_v16 = vunpack.c.h.bf16 %v4199_v27  ;;  %v3718_v27 = vld [vmem:[%s4426_s12 + $0x70] ss:$8 sps:$4 sm:$0xff]  }
 0x3fc   : > { %v3525_v11 = vpop.f32.mrf.mxu1 }
 0x3fd   : > { %3579 = vmatprep.mubr.bf16.mxu0 %v1921_v10  ;;  %v2064_v10 = vunpack.c.l.bf16 %v4205_v28 }
 0x3fe   : > { %v1642_v17 = vpop.f32.mrf.mxu1 }
 0x400   : > { %v3526_v19 = vpop.f32.mrf.mxu1 }
 0x402   : > { %v1685_v20 = vpop.f32.mrf.mxu0 }
 0x404   : > { %v3531_v62 = vpop.f32.mrf.mxu0 }
 0x405   : > { %v2065_v62 = vunpack.c.h.bf16 %v4205_v28 }
 0x406   : > { %v1688_v22 = vpop.f32.mrf.mxu0 }
 0x408   : > { %v3532_v23 = vpop.f32.mrf.mxu0 }
 0x409   : > { %v3720_v23 = vld [vmem:[%s4426_s12 + $0x74] ss:$8 sps:$4 sm:$0xff]  }
 0x40a   : > { %v1731_v24 = vpop.f32.mrf.mxu1  ;;  %v1777_v26 = vpop.f32.mrf.mxu0  ;;  %2299 = vmatprep.subr.bf16.mxu1 %v3720_v23 }
 0x40b   : > { %v1922_v32 = vpack.c.bf16 %v1731_v24, %v1685_v20  ;;  %2300 = vmatpush1.bf16.msra.mxu1 %v3718_v27 }
 0x40c   : > { %v3537_v34 = vpop.f32.mrf.mxu1  ;;  %v3543_v36 = vpop.f32.mrf.mxu0 }
 0x40d   : > { %3580 = vmatmul.mubr.bf16.vlgmr.msra.gmra.mxu0 %v1922_v32 }
 0x40e   : > { %v1734_v37 = vpop.f32.mrf.mxu1  ;;  %v1780_v39 = vpop.f32.mrf.mxu0 }
 0x410   : > { %v3538_v40 = vpop.f32.mrf.mxu1  ;;  %v3544_v41 = vpop.f32.mrf.mxu0 }
 0x412   : > { %v1823_v43 = vpop.f32.mrf.mxu1  ;;  %v1869_v45 = vpop.f32.mrf.mxu0 }
 0x413   : > { %v1923_v44 = vpack.c.bf16 %v1823_v43, %v1777_v26 }
 0x414   : > { %v3549_v46 = vpop.f32.mrf.mxu1  ;;  %v3555_v47 = vpop.f32.mrf.mxu0 }
 0x415   : > { %3583 = vmatprep.mubr.bf16.mxu0 %v1923_v44 }
 0x416   : > { %v1826_v48 = vpop.f32.mrf.mxu1  ;;  %v1872_v49 = vpop.f32.mrf.mxu0 }
 0x418   : > { %v3550_v55 = vpop.f32.mrf.mxu1  ;;  %v3556_v50 = vpop.f32.mrf.mxu0 }
 0x419   : > { %v3723_v50 = vld [vmem:[%s4426_s12 + $0x64] ss:$8 sps:$4 sm:$0xff]  }
 0x41a   : > { %v1915_v51 = vpop.f32.mrf.mxu1  ;;  %2301 = vmatprep.subr.bf16.mxu1 %v3723_v50 }
 0x41b   : > { %v1924_v54 = vpack.c.bf16 %v1915_v51, %v1869_v45 }
 0x41c   : > { %v3561_v31 = vpop.f32.mrf.mxu1 }
 0x41d   : > { %3584 = vmatmul.mubr.bf16.gmra.mxu0 %v1924_v54  ;;  %v3721_v54 = vld [vmem:[%s4426_s12 + $0x60] ss:$8 sps:$4 sm:$0xff]  }
 0x41e   : > { %v1918_v3 = vpop.f32.mrf.mxu1  ;;  %2302 = vmatpush1.bf16.msra.mxu1 %v3721_v54 }
 0x420   : > { %v3562_v56 = vpop.f32.mrf.mxu1 }
 0x4cd   : > { %v3581_v42 = vpop.f32.mrf.mxu0 }
 0x4ce   : > { %v2036_v63 = vadd.f32 %v3581_v42, %v3274_v59 }
 0x4cf   : > { %v2027_v35 = vpop.f32.mrf.mxu0 }
 0x4d0   : > { %v2028_v61 = vadd.f32 %v3274_v59, %v2027_v35  ;;  %v2068_v6 = vadd.f32 %v2060_v2, %v2036_v63  ;;  %v3729_v2 = vld [vmem:[%s4426_s12 + $0x44] ss:$8 sps:$4 sm:$0xff]  }
 0x4d1   : > { %v3582_v21 = vpop.f32.mrf.mxu0 }
 0x4d2   : > { %v2066_v1 = vadd.f32 %v2058_v58, %v2028_v61  ;;  %v2039_v5 = vadd.f32 %v3582_v21, %v3274_v59  ;;  %v3726_v58 = vld [vmem:[%s4426_s12 + $0x54] ss:$8 sps:$4 sm:$0xff]   ;;  %v3724_v61 = vld [vmem:[%s4426_s12 + $0x50] ss:$8 sps:$4 sm:$0xff]  }
 0x4d3   : > { %v2030_v38 = vpop.f32.mrf.mxu0  ;;  %2303 = vmatprep.subr.bf16.mxu1 %v3726_v58 }
 0x4d4   : > { %v2031_v18 = vadd.f32 %v3274_v59, %v2030_v38  ;;  %2074 = vadd.xlane.f32.xlu0 %v2066_v1  ;;  %v2069_v7 = vadd.f32 %v2061_v33, %v2039_v5  ;;  %2304 = vmatpush1.bf16.msra.mxu1 %v3724_v61  ;;  %v3735_v33 = vld [vmem:[%s4426_s12 + $0x24] ss:$8 sps:$4 sm:$0xff]  }
 0x4d5   : > { %2305 = vmatprep.subr.bf16.mxu1 %v3729_v2 }
 0x4d6   : > { %v2067_v30 = vadd.f32 %v2059_v12, %v2031_v18  ;;  %v3727_v18 = vld [vmem:[%s4426_s12 + $0x40] ss:$8 sps:$4 sm:$0xff]  }
 0x4d8   : > { %2076 = vadd.xlane.f32.xlu1 %v2067_v30  ;;  %2078 = vadd.xlane.f32.xlu0 %v2068_v6 }
 0x4d9   : > { %2306 = vmatpush1.bf16.msra.mxu1 %v3727_v18 }
 0x4dc   : > { %2080 = vadd.xlane.f32.xlu1 %v2069_v7 }
 0x4dd   : > { %v3585_v8 = vpop.f32.mrf.mxu0 }
 0x4de   : > { %v2052_v14 = vadd.f32 %v3585_v8, %v3274_v59  ;;  %v3738_v8 = vld [vmem:[%s4426_s12 + $0x14] ss:$8 sps:$4 sm:$0xff]  }
 0x4df   : > { %v2043_v52 = vpop.f32.mrf.mxu0 }
 0x4e0   : > { %v2044_v53 = vadd.f32 %v3274_v59, %v2043_v52  ;;  %v2072_v20 = vadd.f32 %v2064_v10, %v2052_v14  ;;  %v3741_v52 = vld [vmem:[%s4426_s12 + $0x4] ss:$8 sps:$4 sm:$0xff]  }
 0x4e1   : > { %v3586_v13 = vpop.f32.mrf.mxu0 }
 0x4e2   : > { %v2070_v15 = vadd.f32 %v2062_v9, %v2044_v53  ;;  %v2055_v25 = vadd.f32 %v3586_v13, %v3274_v59  ;;  %v3736_v9 = vld [vmem:[%s4426_s12 + $0x10] ss:$8 sps:$4 sm:$0xff]   ;;  %v3739_v53 = vld [vmem:[%s4426_s12] ss:$8 sps:$4 sm:$0xff]  }
 0x4e3   : > { %v2046_v11 = vpop.f32.mrf.mxu0 }
 0x4e4   : > { %v2047_v17 = vadd.f32 %v3274_v59, %v2046_v11  ;;  %2082 = vadd.xlane.f32.xlu0 %v2070_v15  ;;  %v2073_v22 = vadd.f32 %v2065_v62, %v2055_v25 }
 0x4e6   : > { %v2071_v19 = vadd.f32 %v2063_v16, %v2047_v17 }
 0x4e8   : > { %2084 = vadd.xlane.f32.xlu1 %v2071_v19  ;;  %2086 = vadd.xlane.f32.xlu0 %v2072_v20 }
 0x4ec   : > { %2088 = vadd.xlane.f32.xlu1 %v2073_v22 }
 0x55d   : > { %v2075_v28 = vpop.xlane.xlu0 %2074 }
 0x55e   : > { %v2091_v24 = vmul.f32 0.0078125, %v2075_v28 }
 0x560   : > { %v4435_v26 = vsub.f32 %v2066_v1, %v2091_v24 }
 0x561   : > { %v2077_v32 = vpop.xlane.xlu1 %2076  ;;  %v2079_v34 = vpop.xlane.xlu0 %2078 }
 0x562   : > { %v2092_v36 = vmul.f32 0.0078125, %v2077_v32  ;;  %v2093_v37 = vmul.f32 0.0078125, %v2079_v34  ;;  %v2107_v39 = vmul.f32 %v4435_v26, %v4435_v26  ;;  %v3283_v32 = vld [vmem:[%s4221_s27 + $0x4] ss:$0 sm:$0xff] }
 0x564   : > { %v4439_v40 = vsub.f32 %v2067_v30, %v2092_v36  ;;  %v4441_v41 = vsub.f32 %v2068_v6, %v2093_v37  ;;  %2115 = vadd.xlane.f32.xlu0 %v2107_v39  ;;  %v3730_v30 = vld [vmem:[%s4426_s12 + $0x30] ss:$8 sps:$4 sm:$0xff]   ;;  %v3732_v6 = vld [vmem:[%s4426_s12 + $0x34] ss:$8 sps:$4 sm:$0xff]  }
 0x565   : > { %v2081_v43 = vpop.xlane.xlu1 %2080  ;;  %2307 = vmatprep.subr.bf16.mxu1 %v3732_v6 }
 0x566   : > { %v2094_v45 = vmul.f32 0.0078125, %v2081_v43  ;;  %v2108_v44 = vmul.f32 %v4439_v40, %v4439_v40  ;;  %v2109_v46 = vmul.f32 %v4441_v41, %v4441_v41  ;;  %2308 = vmatpush1.bf16.msra.mxu1 %v3730_v30 }
 0x567   : > { %2309 = vmatprep.subr.bf16.mxu1 %v3735_v33 }
 0x568   : > { %v4447_v47 = vsub.f32 %v2069_v7, %v2094_v45  ;;  %2117 = vadd.xlane.f32.xlu1 %v2108_v44  ;;  %2119 = vadd.xlane.f32.xlu0 %v2109_v46  ;;  %v3733_v7 = vld [vmem:[%s4426_s12 + $0x20] ss:$8 sps:$4 sm:$0xff]  }
 0x56a   : > { %v2110_v48 = vmul.f32 %v4447_v47, %v4447_v47  ;;  %2310 = vmatpush1.bf16.msra.mxu1 %v3733_v7 }
 0x56b   : > { %2311 = vmatprep.subr.bf16.mxu1 %v3738_v8 }
 0x56c   : > { %2121 = vadd.xlane.f32.xlu1 %v2110_v48 }
 0x56d   : > { %v2083_v49 = vpop.xlane.xlu0 %2082 }
 0x56e   : > { %v2095_v55 = vmul.f32 0.0078125, %v2083_v49  ;;  %2312 = vmatpush1.bf16.msra.mxu1 %v3736_v9 }
 0x56f   : > { %2313 = vmatprep.subr.bf16.mxu1 %v3741_v52 }
 0x570   : > { %v4452_v51 = vsub.f32 %v2070_v15, %v2095_v55  ;;  %v3284_v55 = vld [vmem:[%s4221_s27 + $0x5] ss:$0 sm:$0xff] }
 0x571   : > { %v2085_v31 = vpop.xlane.xlu1 %2084  ;;  %v2087_v3 = vpop.xlane.xlu0 %2086 }
 0x572   : > { %v2096_v56 = vmul.f32 0.0078125, %v2085_v31  ;;  %v2097_v42 = vmul.f32 0.0078125, %v2087_v3  ;;  %v2111_v57 = vmul.f32 %v4452_v51, %v4452_v51  ;;  %2314 = vmatpush1.bf16.msra.mxu1 %v3739_v53 }
 0x573   : > { %3587 = vmatprep.subr.bf16.mxu1 %v3984_v29 }
 0x574   : > { %v4458_v59 = vsub.f32 %v2071_v19, %v2096_v56  ;;  %v4460_v35 = vsub.f32 %v2072_v20, %v2097_v42  ;;  %2123 = vadd.xlane.f32.xlu0 %v2111_v57 }
 0x575   : > { %v2089_v21 = vpop.xlane.xlu1 %2088 }
 0x576   : > { %v2098_v63 = vmul.f32 0.0078125, %v2089_v21  ;;  %v2112_v1 = vmul.f32 %v4458_v59, %v4458_v59  ;;  %v2113_v12 = vmul.f32 %v4460_v35, %v4460_v35 }
 0x578   : > { %v4468_v38 = vsub.f32 %v2073_v22, %v2098_v63  ;;  %2125 = vadd.xlane.f32.xlu1 %v2112_v1  ;;  %2127 = vadd.xlane.f32.xlu0 %v2113_v12 }
 0x57a   : > { %v2114_v5 = vmul.f32 %v4468_v38, %v4468_v38 }
 0x57c   : > { %2129 = vadd.xlane.f32.xlu1 %v2114_v5 }
 0x5ed   : > { %v2116_v13 = vpop.xlane.xlu0 %2115 }
 0x5ee   : > { %v2131_v14 = vmul.f32 0.0078125, %v2116_v13 }
 0x5f0   : > { %v2139_v15 = vadd.f32 1e-12, %v2131_v14 }
 0x5f1   : > { %v2118_v16 = vpop.xlane.xlu1 %2117  ;;  %v2120_v10 = vpop.xlane.xlu0 %2119 }
 0x5f2   : > { %3802 = vrsqrt.f32 %v2139_v15  ;;  %v2132_v11 = vmul.f32 0.0078125, %v2118_v16  ;;  %v2133_v17 = vmul.f32 0.0078125, %v2120_v10  ;;  %v3743_v16 = vld [vmem:[%s4433_s23 + $0x38] sm:$0xff]   ;;  %v3745_v10 = vld [vmem:[%s4433_s23 + $0x30] sm:$0xff]  }
 0x5f4   : > { %v2140_v25 = vadd.f32 1e-12, %v2132_v11  ;;  %v2141_v19 = vadd.f32 1e-12, %v2133_v17  ;;  %v3746_v11 = vld [vmem:[%s4433_s23 + $0x68] sm:$0xff]  }
 0x5f5   : > { %v2122_v20 = vpop.xlane.xlu1 %2121  ;;  %v3747_v17 = vld [vmem:[%s4433_s23 + $0x28] sm:$0xff]  }
 0x5f6   : > { %3804 = vrsqrt.f32 %v2140_v25  ;;  %v2134_v62 = vmul.f32 0.0078125, %v2122_v20  ;;  %v3748_v25 = vld [vmem:[%s4433_s23 + $0x60] sm:$0xff]   ;;  %v3750_v20 = vld [vmem:[%s4433_s23 + $0x58] sm:$0xff]  }
 0x5f7   : > { %3806 = vrsqrt.f32 %v2141_v19  ;;  %v3749_v19 = vld [vmem:[%s4433_s23 + $0x20] sm:$0xff]  }
 0x5f8   : > { %v2142_v22 = vadd.f32 1e-12, %v2134_v62  ;;  %v3751_v62 = vld [vmem:[%s4433_s23 + $0x18] sm:$0xff]  }
 0x5fa   : > { %3808 = vrsqrt.f32 %v2142_v22  ;;  %v3752_v22 = vld [vmem:[%s4433_s23 + $0x50] sm:$0xff]  }
 0x5fd   : > { %v2124_v27 = vpop.xlane.xlu0 %2123 }
 0x5fe   : > { %v2135_v23 = vmul.f32 0.0078125, %v2124_v27  ;;  %v3753_v27 = vld [vmem:[%s4433_s23 + $0x10] sm:$0xff]  }
 0x5ff   : > { %v3803_v28 = vpop.eup %3802 }
 0x600   : > { %v2143_v24 = vadd.f32 1e-12, %v2135_v23  ;;  %v2155_v34 = vmul.f32 %v3803_v28, %v4435_v26  ;;  %v3754_v23 = vld [vmem:[%s4433_s23 + $0x48] sm:$0xff]  }
 0x601   : > { %v2126_v36 = vpop.xlane.xlu1 %2125  ;;  %v2128_v37 = vpop.xlane.xlu0 %2127  ;;  %v3755_v28 = vld [vmem:[%s4433_s23 + $0x8] sm:$0xff]  }
 0x602   : > { %3810 = vrsqrt.f32 %v2143_v24  ;;  %v2136_v39 = vmul.f32 0.0078125, %v2126_v36  ;;  %v2137_v43 = vmul.f32 0.0078125, %v2128_v37  ;;  %v2167_v44 = vmul.f32 %v3283_v32, %v2155_v34  ;;  %v3756_v24 = vld [vmem:[%s4433_s23 + $0x40] sm:$0xff]  }
 0x603   : > { %v3805_v45 = vpop.eup %3804  ;;  %v2207_v34 = vld [vmem:[%s4139_s28] sm:$0x3]  ;;  %v2215_v36 = vsub.s32 1, %v4308_v60 }
 0x604   : > { %v3807_v46 = vpop.eup %3806  ;;  %v2144_v48 = vadd.f32 1e-12, %v2136_v39  ;;  %v2145_v49 = vadd.f32 1e-12, %v2137_v43  ;;  %v2156_v50 = vmul.f32 %v3805_v45, %v4439_v40  ;;  %v4486_v42 = vadd.f32 %v3284_v55, %v2167_v44 }
 0x605   : > { %v2130_v54 = vpop.xlane.xlu1 %2129  ;;  %v2157_v26 = vmul.f32 %v3807_v46, %v4441_v41  ;;  %v4540_v37 = vrot.slane %v2207_v34, %v4315_v4  ;;  %v4542_v39 = vrot.slane %v2207_v34, %v2215_v36 }
 0x606   : > { %3812 = vrsqrt.f32 %v2144_v48  ;;  %v2138_v31 = vmul.f32 0.0078125, %v2130_v54  ;;  %v2168_v3 = vmul.f32 %v3283_v32, %v2156_v50 }
 0x607   : > { %v3809_v56 = vpop.eup %3808  ;;  %3814 = vrsqrt.f32 %v2145_v49  ;;  %v2169_v63 = vmul.f32 %v3283_v32, %v2157_v26 }
 0x608   : > { %v2146_v57 = vadd.f32 1e-12, %v2138_v31  ;;  %v4489_v58 = vadd.f32 %v3284_v55, %v2168_v3  ;;  %v2158_v61 = vmul.f32 %v3809_v56, %v4447_v47 }
 0x609   : > { %v4497_v2 = vadd.f32 %v3284_v55, %v2169_v63 }
 0x60a   : > { %3816 = vrsqrt.f32 %v2146_v57  ;;  %v2187_v21 = vpack.c.bf16 %v4489_v58, %v4486_v42  ;;  %v2170_v40 = vmul.f32 %v3283_v32, %v2158_v61 }
 0x60c   : > { %2332 = vmatmul.mubr.bf16.vlgmr.msra.gmra.mxu1 %v2187_v21  ;;  %v4495_v1 = vadd.f32 %v3284_v55, %v2170_v40 }
 0x60d   : > { %2341 = vmatprep.mubr.bf16.mxu1 %v3983_v0 }
 0x60e   : > { %v2188_v18 = vpack.c.bf16 %v4495_v1, %v4497_v2 }
 0x60f   : > { %v3811_v12 = vpop.eup %3810 }
 0x610   : > { %v2159_v41 = vmul.f32 %v3811_v12, %v4452_v51 }
 0x612   : > { %v2171_v30 = vmul.f32 %v3283_v32, %v2159_v41 }
 0x613   : > { %v3813_v47 = vpop.eup %3812 }
 0x614   : > { %2342 = vmatmul.mubr.bf16.gmra.mxu1 %v2188_v18  ;;  %v2160_v5 = vmul.f32 %v3813_v47, %v4458_v59  ;;  %v3815_v6 = vpop.eup %3814  ;;  %v4504_v8 = vadd.f32 %v3284_v55, %v2171_v30 }
 0x615   : > { %2351 = vmatprep.mubr.bf16.mxu1 %v3983_v0  ;;  %v2161_v51 = vmul.f32 %v3815_v6, %v4460_v35 }
 0x616   : > { %v2172_v33 = vmul.f32 %v3283_v32, %v2160_v5 }
 0x617   : > { %v3817_v7 = vpop.eup %3816  ;;  %v2173_v13 = vmul.f32 %v3283_v32, %v2161_v51 }
 0x618   : > { %v4506_v9 = vadd.f32 %v3284_v55, %v2172_v33  ;;  %v2162_v52 = vmul.f32 %v3817_v7, %v4468_v38  ;;  %v3742_v38 = vld [vmem:[%s4433_s23 + $0x78] sm:$0xff]  }
 0x619   : > { %v4515_v15 = vadd.f32 %v3284_v55, %v2173_v13  ;;  %3394 = vmatprep.subr.bf16.mxu0 %v3742_v38 }
 0x61a   : > { %v2189_v59 = vpack.c.bf16 %v4506_v9, %v4504_v8  ;;  %v2174_v53 = vmul.f32 %v3283_v32, %v2162_v52  ;;  %3395 = vmatpush3.bf16.msra.mxu0 %v3743_v16  ;;  %v3757_v32 = vld [vmem:[%s4433_s23] sm:$0xff]  }
 0x61c   : > { %2352 = vmatmul.mubr.bf16.gmra.mxu1 %v2189_v59  ;;  %v4513_v14 = vadd.f32 %v3284_v55, %v2174_v53 }
 0x61d   : > { %2361 = vmatprep.mubr.bf16.mxu1 %v3983_v0  ;;  %v3744_v0 = vld [vmem:[%s4433_s23 + $0x70] sm:$0xff]  }
 0x61e   : > { %v2190_v35 = vpack.c.bf16 %v4513_v14, %v4515_v15  ;;  %3396 = vmatprep.subr.bf16.mxu0 %v3744_v0 }
 0x61f   : > { %3397 = vmatpush3.bf16.msra.mxu0 %v3745_v10 }
 0x620   : > { %3398 = vmatprep.subr.bf16.mxu0 %v3746_v11 }
 0x623   : > { %3399 = vmatpush3.bf16.msra.mxu0 %v3747_v17 }
 0x624   : > { %2362 = vmatmul.mubr.bf16.gmra.mxu1 %v2190_v35  ;;  %3400 = vmatprep.subr.bf16.mxu0 %v3748_v25 }
 0x625   : > { %3603 = vmatprep.mubr.msk.bf16.mxu1 %vm3985_vm0, %v3984_v29 }
 0x627   : > { %3401 = vmatpush3.bf16.msra.mxu0 %v3749_v19 }
 0x628   : > { %3402 = vmatprep.subr.bf16.mxu0 %v3750_v20 }
 0x62b   : > { %3403 = vmatpush3.bf16.msra.mxu0 %v3751_v62 }
 0x62c   : > { %3404 = vmatprep.subr.bf16.mxu0 %v3752_v22 }
 0x62f   : > { %3405 = vmatpush3.bf16.msra.mxu0 %v3753_v27 }
 0x630   : > { %3406 = vmatprep.subr.bf16.mxu0 %v3754_v23 }
 0x633   : > { %3407 = vmatpush3.bf16.msra.mxu0 %v3755_v28 }
 0x634   : > { %3408 = vmatprep.subr.bf16.mxu0 %v3756_v24 }
 0x637   : > { %3409 = vmatpush3.bf16.msra.mxu0 %v3757_v32 }
 0x6cc   : > { %v2333_v43 = vpop.f32.mrf.mxu1 }
 0x6cd   : > { %v4545_v45 = vadd.f32 %v2333_v43, %v4540_v37 }
 0x6ce   : > { %v2335_v44 = vpop.f32.mrf.mxu1 }
 0x6cf   : > { %v2372_v46 = vmul.f32 %v4545_v45, %v4545_v45  ;;  %v4550_v48 = vadd.f32 %v2335_v44, %v4542_v39 }
 0x6d0   : > { %v2337_v49 = vpop.f32.mrf.mxu1 }
 0x6d1   : > { %v2388_v55 = vmul.f32 %v2372_v46, %v4545_v45  ;;  %v2373_v60 = vmul.f32 %v4550_v48, %v4550_v48  ;;  %v4556_v4 = vadd.f32 %v2337_v49, %v4540_v37 }
 0x6d2   : > { %v2339_v50 = vpop.f32.mrf.mxu1 }
 0x6d3   : > { %v2404_v54 = vmul.f32 0.044715, %v2388_v55  ;;  %v2389_v31 = vmul.f32 %v2373_v60, %v4550_v48  ;;  %v2374_v3 = vmul.f32 %v4556_v4, %v4556_v4  ;;  %v4562_v56 = vadd.f32 %v2339_v50, %v4542_v39 }
 0x6d4   : > { %v2343_v26 = vpop.f32.mrf.mxu1 }
 0x6d5   : > { %v2420_v57 = vadd.f32 %v2404_v54, %v4545_v45  ;;  %v2405_v61 = vmul.f32 0.044715, %v2389_v31  ;;  %v2390_v21 = vmul.f32 %v2374_v3, %v4556_v4  ;;  %v2375_v40 = vmul.f32 %v4562_v56, %v4562_v56 }
 0x6d6   : > { %v4569_v63 = vadd.f32 %v2343_v26, %v4540_v37  ;;  %v2345_v12 = vpop.f32.mrf.mxu1 }
 0x6d7   : > { %v2436_v41 = vmul.f32 0.7978846, %v2420_v57  ;;  %v2421_v18 = vadd.f32 %v2405_v61, %v4550_v48  ;;  %v2406_v47 = vmul.f32 0.044715, %v2390_v21  ;;  %v2391_v5 = vmul.f32 %v2375_v40, %v4562_v56 }
 0x6d8   : > { %v2376_v30 = vmul.f32 %v4569_v63, %v4569_v63  ;;  %v4576_v6 = vadd.f32 %v2345_v12, %v4542_v39  ;;  %v2347_v33 = vpop.f32.mrf.mxu1 }
 0x6d9   : > { %3818 = vtanh.f32 %v2436_v41  ;;  %v2437_v7 = vmul.f32 0.7978846, %v2421_v18  ;;  %v2422_v51 = vadd.f32 %v2406_v47, %v4556_v4  ;;  %v2407_v52 = vmul.f32 0.044715, %v2391_v5 }
 0x6da   : > { %v2392_v59 = vmul.f32 %v2376_v30, %v4569_v63  ;;  %v2377_v53 = vmul.f32 %v4576_v6, %v4576_v6  ;;  %v4583_v13 = vadd.f32 %v2347_v33, %v4540_v37  ;;  %v2349_v35 = vpop.f32.mrf.mxu1 }
 0x6db   : > { %v2438_v38 = vmul.f32 0.7978846, %v2422_v51  ;;  %v2423_v16 = vadd.f32 %v2407_v52, %v4562_v56  ;;  %v4587_v0 = vadd.f32 %v2349_v35, %v4542_v39  ;;  %3820 = vtanh.f32 %v2437_v7 }
 0x6dc   : > { %v2408_v10 = vmul.f32 0.044715, %v2392_v59  ;;  %v2393_v11 = vmul.f32 %v2377_v53, %v4576_v6  ;;  %v2378_v17 = vmul.f32 %v4583_v13, %v4583_v13  ;;  %v2353_v25 = vpop.f32.mrf.mxu1 }
 0x6dd   : > { %3822 = vtanh.f32 %v2438_v38  ;;  %v2439_v19 = vmul.f32 0.7978846, %v2423_v16  ;;  %v2379_v20 = vmul.f32 %v4587_v0, %v4587_v0  ;;  %v4595_v62 = vadd.f32 %v2353_v25, %v4540_v37 }
 0x6de   : > { %v2424_v22 = vadd.f32 %v2408_v10, %v4569_v63  ;;  %v2409_v27 = vmul.f32 0.044715, %v2393_v11  ;;  %v2394_v23 = vmul.f32 %v2378_v17, %v4583_v13  ;;  %v2355_v28 = vpop.f32.mrf.mxu1 }
 0x6df   : > { %3824 = vtanh.f32 %v2439_v19  ;;  %v2395_v24 = vmul.f32 %v2379_v20, %v4587_v0  ;;  %v2380_v32 = vmul.f32 %v4595_v62, %v4595_v62  ;;  %v4603_v34 = vadd.f32 %v2355_v28, %v4542_v39 }
 0x6e0   : > { %v2440_v36 = vmul.f32 0.7978846, %v2424_v22  ;;  %v2425_v43 = vadd.f32 %v2409_v27, %v4576_v6  ;;  %v2410_v44 = vmul.f32 0.044715, %v2394_v23  ;;  %v2357_v46 = vpop.f32.mrf.mxu1 }
 0x6e1   : > { %v2411_v49 = vmul.f32 0.044715, %v2395_v24  ;;  %v2396_v55 = vmul.f32 %v2380_v32, %v4595_v62  ;;  %v2381_v60 = vmul.f32 %v4603_v34, %v4603_v34  ;;  %v4610_v50 = vadd.f32 %v2357_v46, %v4540_v37 }
 0x6e2   : > { %3826 = vtanh.f32 %v2440_v36  ;;  %v2441_v54 = vmul.f32 0.7978846, %v2425_v43  ;;  %v2426_v31 = vadd.f32 %v2410_v44, %v4583_v13  ;;  %v2359_v3 = vpop.f32.mrf.mxu1 }
 0x6e3   : > { %v2427_v26 = vadd.f32 %v2411_v49, %v4587_v0  ;;  %v2412_v57 = vmul.f32 0.044715, %v2396_v55  ;;  %v2397_v61 = vmul.f32 %v2381_v60, %v4603_v34  ;;  %v2382_v21 = vmul.f32 %v4610_v50, %v4610_v50 }
 0x6e4   : > { %3828 = vtanh.f32 %v2441_v54  ;;  %v2442_v40 = vmul.f32 0.7978846, %v2426_v31  ;;  %v4618_v12 = vadd.f32 %v2359_v3, %v4542_v39  ;;  %v2363_v41 = vpop.f32.mrf.mxu1 }
 0x6e5   : > { %v2443_v18 = vmul.f32 0.7978846, %v2427_v26  ;;  %v2428_v47 = vadd.f32 %v2412_v57, %v4595_v62  ;;  %v2413_v5 = vmul.f32 0.044715, %v2397_v61  ;;  %v2398_v30 = vmul.f32 %v2382_v21, %v4610_v50 }
 0x6e6   : > { %v3819_v33 = vpop.eup %3818  ;;  %3830 = vtanh.f32 %v2442_v40  ;;  %v2383_v7 = vmul.f32 %v4618_v12, %v4618_v12  ;;  %v4625_v51 = vadd.f32 %v2363_v41, %v4540_v37  ;;  %v2365_v52 = vpop.f32.mrf.mxu1 }
 0x6e7   : > { %v2468_v59 = vadd.f32 1.0, %v3819_v33  ;;  %3832 = vtanh.f32 %v2443_v18  ;;  %v2444_v53 = vmul.f32 0.7978846, %v2428_v47  ;;  %v2429_v35 = vadd.f32 %v2413_v5, %v4603_v34 }
 0x6e8   : > { %v2414_v38 = vmul.f32 0.044715, %v2398_v30  ;;  %v2399_v16 = vmul.f32 %v2383_v7, %v4618_v12  ;;  %v2384_v10 = vmul.f32 %v4625_v51, %v4625_v51  ;;  %v4632_v11 = vadd.f32 %v2365_v52, %v4542_v39  ;;  %v2367_v17 = vpop.f32.mrf.mxu1  ;;  %v3821_v25 = vpop.eup %3820 }
 0x6e9   : > { %3834 = vtanh.f32 %v2444_v53  ;;  %v2445_v19 = vmul.f32 0.7978846, %v2429_v35  ;;  %v4635_v20 = vadd.f32 %v2367_v17, %v4540_v37  ;;  %v2484_v36 = vmul.f32 0.5, %v2468_v59 }
 0x6ea   : > { %v3823_v22 = vpop.eup %3822  ;;  %v2430_v27 = vadd.f32 %v2414_v38, %v4610_v50  ;;  %v2415_v23 = vmul.f32 0.044715, %v2399_v16  ;;  %v2400_v28 = vmul.f32 %v2384_v10, %v4625_v51  ;;  %v2385_v24 = vmul.f32 %v4632_v11, %v4632_v11  ;;  %v2369_v32 = vpop.f32.mrf.mxu1 }
 0x6eb   : > { %v2470_v43 = vadd.f32 1.0, %v3823_v22  ;;  %3836 = vtanh.f32 %v2445_v19  ;;  %v2386_v44 = vmul.f32 %v4635_v20, %v4635_v20  ;;  %v4647_v3 = vadd.f32 %v2369_v32, %v4542_v39 }
 0x6ec   : > { %v3825_v46 = vpop.eup %3824  ;;  %v2446_v49 = vmul.f32 0.7978846, %v2430_v27  ;;  %v2431_v37 = vadd.f32 %v2415_v23, %v4618_v12  ;;  %v2416_v55 = vmul.f32 0.044715, %v2400_v28  ;;  %v2401_v60 = vmul.f32 %v2385_v24, %v4632_v11 }
 0x6ed   : > { %v2486_v54 = vmul.f32 0.5, %v2470_v43  ;;  %v2402_v31 = vmul.f32 %v2386_v44, %v4635_v20  ;;  %v2469_v26 = vadd.f32 1.0, %v3821_v25  ;;  %v2387_v18 = vmul.f32 %v4647_v3, %v4647_v3 }
 0x6ee   : > { %3838 = vtanh.f32 %v2446_v49  ;;  %v2447_v57 = vmul.f32 0.7978846, %v2431_v37  ;;  %v2432_v61 = vadd.f32 %v2416_v55, %v4625_v51  ;;  %v2417_v21 = vmul.f32 0.044715, %v2401_v60 }
 0x6ef   : > { %v3827_v40 = vpop.eup %3826  ;;  %v2418_v41 = vmul.f32 0.044715, %v2402_v31  ;;  %v2471_v47 = vadd.f32 1.0, %v3825_v46  ;;  %v2485_v33 = vmul.f32 0.5, %v2469_v26  ;;  %v2500_v39 = vmul.f32 %v2484_v36, %v4545_v45 }
 0x6f0   : > { %3840 = vtanh.f32 %v2447_v57  ;;  %v2448_v5 = vmul.f32 0.7978846, %v2432_v61  ;;  %v2433_v30 = vadd.f32 %v2417_v21, %v4632_v11  ;;  %v2403_v59 = vmul.f32 %v2387_v18, %v4647_v3 }
 0x6f1   : > { %v3829_v7 = vpop.eup %3828  ;;  %v2434_v52 = vadd.f32 %v2418_v41, %v4635_v20  ;;  %v2487_v53 = vmul.f32 0.5, %v2471_v47  ;;  %v2502_v35 = vmul.f32 %v2486_v54, %v4556_v4  ;;  %v2501_v19 = vmul.f32 %v2485_v33, %v4550_v48 }
 0x6f2   : > { %3842 = vtanh.f32 %v2448_v5  ;;  %v2449_v38 = vmul.f32 0.7978846, %v2433_v30  ;;  %v2473_v16 = vadd.f32 1.0, %v3829_v7  ;;  %v2419_v25 = vmul.f32 0.044715, %v2403_v59 }
 0x6f3   : > { %v3831_v10 = vpop.eup %3830  ;;  %v2450_v17 = vmul.f32 0.7978846, %v2434_v52  ;;  %v2503_v22 = vmul.f32 %v2487_v53, %v4562_v56  ;;  %v2472_v23 = vadd.f32 1.0, %v3827_v40  ;;  %v2516_v43 = vpack.c.bf16 %v2502_v35, %v2500_v39 }
 0x6f4   : > { %v3833_v27 = vpop.eup %3832  ;;  %3844 = vtanh.f32 %v2449_v38  ;;  %v2489_v45 = vmul.f32 0.5, %v2473_v16  ;;  %v2474_v28 = vadd.f32 1.0, %v3831_v10  ;;  %v2435_v24 = vadd.f32 %v2419_v25, %v4647_v3 }
 0x6f5   : > { %3846 = vtanh.f32 %v2450_v17  ;;  %v2517_v32 = vpack.c.bf16 %v2503_v22, %v2501_v19  ;;  %v2475_v4 = vadd.f32 1.0, %v3833_v27  ;;  %v2488_v48 = vmul.f32 0.5, %v2472_v23 }
 0x6f6   : > { %v3835_v36 = vpop.eup %3834  ;;  %v2490_v44 = vmul.f32 0.5, %v2474_v28  ;;  %v2451_v46 = vmul.f32 0.7978846, %v2435_v24  ;;  %v2505_v56 = vmul.f32 %v2489_v45, %v4576_v6  ;;  %v3301_v24 = vld [vmem:[%s4221_s27 + $0x6] ss:$0 sm:$0xff] }
 0x6f7   : > { %2688 = vmatprep.mubr.bf16.mxu0 %v2517_v32  ;;  %v2491_v49 = vmul.f32 0.5, %v2475_v4  ;;  %v2504_v57 = vmul.f32 %v2488_v48, %v4569_v63  ;;  %v2476_v61 = vadd.f32 1.0, %v3835_v36 }
 0x6f8   : > { %v3837_v37 = vpop.eup %3836  ;;  %2689 = vmatmul.mubr.bf16.vlgmr.msra.gmra.mxu0 %v2516_v43  ;;  %3848 = vtanh.f32 %v2451_v46  ;;  %v2506_v60 = vmul.f32 %v2490_v44, %v4583_v13 }
 0x6f9   : > { %v2507_v55 = vmul.f32 %v2491_v49, %v4587_v0  ;;  %v2477_v54 = vadd.f32 1.0, %v3837_v37  ;;  %v2492_v33 = vmul.f32 0.5, %v2476_v61 }
 0x6fa   : > { %v2518_v41 = vpack.c.bf16 %v2506_v60, %v2504_v57 }
 0x6fb   : > { %v3839_v31 = vpop.eup %3838  ;;  %v2519_v26 = vpack.c.bf16 %v2507_v55, %v2505_v56  ;;  %v2493_v47 = vmul.f32 0.5, %v2477_v54  ;;  %v2508_v35 = vmul.f32 %v2492_v33, %v4595_v62 }
 0x6fc   : > { %v2478_v21 = vadd.f32 1.0, %v3839_v31 }
 0x6fd   : > { %v3841_v40 = vpop.eup %3840  ;;  %2696 = vmatprep.mubr.bf16.mxu0 %v2519_v26  ;;  %v2509_v13 = vmul.f32 %v2493_v47, %v4603_v34 }
 0x6fe   : > { %v2479_v18 = vadd.f32 1.0, %v3841_v40  ;;  %v2494_v5 = vmul.f32 0.5, %v2478_v21 }
 0x6ff   : > { %v3843_v30 = vpop.eup %3842 }
 0x700   : > { %2697 = vmatmul.mubr.bf16.gmra.mxu0 %v2518_v41  ;;  %v2495_v6 = vmul.f32 0.5, %v2479_v18  ;;  %v2510_v63 = vmul.f32 %v2494_v5, %v4610_v50  ;;  %v2480_v38 = vadd.f32 1.0, %v3843_v30 }
 0x701   : > { %v3845_v0 = vpop.eup %3844 }
 0x702   : > { %v3847_v7 = vpop.eup %3846  ;;  %v2511_v39 = vmul.f32 %v2495_v6, %v4618_v12  ;;  %v2481_v52 = vadd.f32 1.0, %v3845_v0  ;;  %v2520_v10 = vpack.c.bf16 %v2510_v63, %v2508_v35  ;;  %v2496_v22 = vmul.f32 0.5, %v2480_v38 }
 0x703   : > { %v2482_v59 = vadd.f32 1.0, %v3847_v7 }
 0x704   : > { %v2521_v53 = vpack.c.bf16 %v2511_v39, %v2509_v13  ;;  %v2497_v19 = vmul.f32 0.5, %v2481_v52  ;;  %v2512_v45 = vmul.f32 %v2496_v22, %v4625_v51 }
 0x705   : > { %v3849_v16 = vpop.eup %3848  ;;  %v2498_v17 = vmul.f32 0.5, %v2482_v59 }
 0x706   : > { %2704 = vmatprep.mubr.bf16.mxu0 %v2521_v53  ;;  %v2483_v25 = vadd.f32 1.0, %v3849_v16  ;;  %v2513_v50 = vmul.f32 %v2497_v19, %v4632_v11 }
 0x707   : > { %v2514_v12 = vmul.f32 %v2498_v17, %v4635_v20 }
 0x708   : > { %2705 = vmatmul.mubr.bf16.gmra.mxu0 %v2520_v10  ;;  %v2499_v34 = vmul.f32 0.5, %v2483_v25 }
 0x709   : > { %v2522_v23 = vpack.c.bf16 %v2514_v12, %v2512_v45 }
 0x70a   : > { %v2515_v27 = vmul.f32 %v2499_v34, %v4647_v3 }
 0x70c   : > { %v2523_v62 = vpack.c.bf16 %v2515_v27, %v2513_v50 }
 0x70e   : > { %2712 = vmatprep.mubr.bf16.mxu0 %v2523_v62 }
 0x710   : > { %2713 = vmatmul.mubr.bf16.gmra.mxu0 %v2522_v23 }
 0x7b8   : > { %v3410_v28 = vpop.f32.mrf.mxu0 }
 0x7ba   : > { %v3411_v32 = vpop.f32.mrf.mxu0 }
 0x7bb   : > { %v3412_v4 = vadd.f32 %v3411_v32, %v3410_v28 }
 0x7bc   : > { %v3413_v36 = vpop.f32.mrf.mxu0 }
 0x7bd   : > { %v2691_v43 = vadd.f32 %v3412_v4, %v3301_v24 }
 0x7be   : > { %v3414_v44 = vpop.f32.mrf.mxu0 }
 0x7bf   : > { %v3415_v46 = vadd.f32 %v3414_v44, %v3413_v36  ;;  %v2721_v20 = vadd.f32 %v2691_v43, %v4486_v42 }
 0x7c0   : > { %v3416_v49 = vpop.f32.mrf.mxu0 }
 0x7c1   : > { %v2694_v11 = vadd.f32 %v3415_v46, %v3301_v24  ;;  %2729 = vadd.xlane.f32.xlu0 %v2721_v20 }
 0x7c2   : > { %v3417_v3 = vpop.f32.mrf.mxu0 }
 0x7c3   : > { %v3418_v37 = vadd.f32 %v3417_v3, %v3416_v49  ;;  %v2722_v51 = vadd.f32 %v2694_v11, %v4489_v58  ;;  %v3758_v11 = vld [vmem:[%s4145_s19 + $0x38] sm:$0xff]   ;;  %v3759_v3 = vld [vmem:[%s4145_s19 + $0x30] sm:$0xff]  }
 0x7c4   : > { %v3419_v48 = vpop.f32.mrf.mxu0  ;;  %3588 = vmatpush3.bf16.msra.mxu1 %v3758_v11 }
 0x7c5   : > { %v2699_v56 = vadd.f32 %v3418_v37, %v3301_v24  ;;  %2731 = vadd.xlane.f32.xlu0 %v2722_v51  ;;  %3589 = vmatprep.subr.bf16.mxu1 %v3984_v29  ;;  %v3760_v37 = vld [vmem:[%s4145_s19 + $0x28] sm:$0xff]  }
 0x7c6   : > { %v3420_v55 = vpop.f32.mrf.mxu0 }
 0x7c7   : > { %v3421_v60 = vadd.f32 %v3420_v55, %v3419_v48  ;;  %v2723_v54 = vadd.f32 %v2699_v56, %v4497_v2  ;;  %v3762_v48 = vld [vmem:[%s4145_s19 + $0x18] sm:$0xff]   ;;  %v3763_v56 = vld [vmem:[%s4145_s19 + $0x10] sm:$0xff]   ;;  %v3764_v55 = vld [vmem:[%s4145_s19 + $0x8] sm:$0xff]  }
 0x7c8   : > { %v3422_v31 = vpop.f32.mrf.mxu0  ;;  %3590 = vmatpush3.bf16.msra.mxu1 %v3759_v3 }
 0x7c9   : > { %v2702_v26 = vadd.f32 %v3421_v60, %v3301_v24  ;;  %2733 = vadd.xlane.f32.xlu1 %v2723_v54  ;;  %3591 = vmatprep.subr.bf16.mxu1 %v3984_v29  ;;  %v3765_v60 = vld [vmem:[%s4145_s19] sm:$0xff]  }
 0x7ca   : > { %v3423_v57 = vpop.f32.mrf.mxu0 }
 0x7cb   : > { %v3424_v61 = vadd.f32 %v3423_v57, %v3422_v31  ;;  %v2724_v42 = vadd.f32 %v2702_v26, %v4495_v1 }
 0x7cc   : > { %v3425_v21 = vpop.f32.mrf.mxu0  ;;  %3592 = vmatpush3.bf16.msra.mxu1 %v3760_v37 }
 0x7cd   : > { %v2707_v40 = vadd.f32 %v3424_v61, %v3301_v24  ;;  %2735 = vadd.xlane.f32.xlu1 %v2724_v42  ;;  %3593 = vmatprep.subr.bf16.mxu1 %v3984_v29 }
 0x7ce   : > { %v3426_v41 = vpop.f32.mrf.mxu0 }
 0x7cf   : > { %v3427_v18 = vadd.f32 %v3426_v41, %v3425_v21  ;;  %v2725_v58 = vadd.f32 %v2707_v40, %v4504_v8 }
 0x7d0   : > { %v3428_v47 = vpop.f32.mrf.mxu0 }
 0x7d1   : > { %v2710_v5 = vadd.f32 %v3427_v18, %v3301_v24  ;;  %2737 = vadd.xlane.f32.xlu0 %v2725_v58 }
 0x7d2   : > { %v3429_v30 = vpop.f32.mrf.mxu0 }
 0x7d3   : > { %v3430_v6 = vadd.f32 %v3429_v30, %v3428_v47  ;;  %v2726_v2 = vadd.f32 %v2710_v5, %v4506_v9 }
 0x7d4   : > { %v3431_v33 = vpop.f32.mrf.mxu0 }
 0x7d5   : > { %v2715_v0 = vadd.f32 %v3430_v6, %v3301_v24  ;;  %2739 = vadd.xlane.f32.xlu1 %v2726_v2 }
 0x7d6   : > { %v3432_v7 = vpop.f32.mrf.mxu0 }
 0x7d7   : > { %v3433_v13 = vadd.f32 %v3432_v7, %v3431_v33  ;;  %v2727_v1 = vadd.f32 %v2715_v0, %v4515_v15 }
 0x7d9   : > { %v2718_v39 = vadd.f32 %v3433_v13, %v3301_v24  ;;  %2741 = vadd.xlane.f32.xlu0 %v2727_v1 }
 0x7db   : > { %v2728_v63 = vadd.f32 %v2718_v39, %v4513_v14 }
 0x7dd   : > { %2743 = vadd.xlane.f32.xlu1 %v2728_v63 }
 0x84a   : > { %v2730_v8 = vpop.xlane.xlu0 %2729 }
 0x84b   : > { %v2745_v52 = vmul.f32 0.0078125, %v2730_v8 }
 0x84d   : > { %v4681_v59 = vsub.f32 %v2721_v20, %v2745_v52 }
 0x84e   : > { %v2732_v53 = vpop.xlane.xlu0 %2731 }
 0x84f   : > { %v2746_v35 = vmul.f32 0.0078125, %v2732_v53  ;;  %v2761_v9 = vmul.f32 %v4681_v59, %v4681_v59 }
 0x851   : > { %v4685_v38 = vsub.f32 %v2722_v51, %v2746_v35  ;;  %2769 = vadd.xlane.f32.xlu0 %v2761_v9  ;;  %v3761_v51 = vld [vmem:[%s4145_s19 + $0x20] sm:$0xff]  }
 0x852   : > { %v2734_v16 = vpop.xlane.xlu1 %2733  ;;  %3594 = vmatpush3.bf16.msra.mxu1 %v3761_v51 }
 0x853   : > { %v2747_v10 = vmul.f32 0.0078125, %v2734_v16  ;;  %v2762_v15 = vmul.f32 %v4685_v38, %v4685_v38  ;;  %3595 = vmatprep.subr.bf16.mxu1 %v3984_v29 }
 0x855   : > { %v4689_v17 = vsub.f32 %v2723_v54, %v2747_v10  ;;  %2771 = vadd.xlane.f32.xlu0 %v2762_v15  ;;  %v3318_v15 = vld [vmem:[%s4221_s27 + $0x7] ss:$0 sm:$0xff] }
 0x856   : > { %v2736_v14 = vpop.xlane.xlu1 %2735  ;;  %3596 = vmatpush3.bf16.msra.mxu1 %v3762_v48 }
 0x857   : > { %v2748_v25 = vmul.f32 0.0078125, %v2736_v14  ;;  %v2763_v19 = vmul.f32 %v4689_v17, %v4689_v17  ;;  %3597 = vmatprep.subr.bf16.mxu1 %v3984_v29 }
 0x859   : > { %v4693_v22 = vsub.f32 %v2724_v42, %v2748_v25  ;;  %2773 = vadd.xlane.f32.xlu1 %v2763_v19 }
 0x85a   : > { %v2738_v34 = vpop.xlane.xlu0 %2737  ;;  %3598 = vmatpush3.bf16.msra.mxu1 %v3763_v56 }
 0x85b   : > { %v2749_v12 = vmul.f32 0.0078125, %v2738_v34  ;;  %v2764_v50 = vmul.f32 %v4693_v22, %v4693_v22  ;;  %3599 = vmatprep.subr.bf16.mxu1 %v3984_v29 }
 0x85d   : > { %v4697_v27 = vsub.f32 %v2725_v58, %v2749_v12  ;;  %2775 = vadd.xlane.f32.xlu1 %v2764_v50  ;;  %v3319_v50 = vld [vmem:[%s4221_s27 + $0x8] ss:$0 sm:$0xff]  ;;  %s590_s27 = scalar_lea.vmem %s4772_s8, %s4794_s16 }
 0x85e   : > { %v2740_v45 = vpop.xlane.xlu1 %2739  ;;  %3600 = vmatpush3.bf16.msra.mxu1 %v3764_v55 }
 0x85f   : > { %v2750_v62 = vmul.f32 0.0078125, %v2740_v45  ;;  %v2765_v23 = vmul.f32 %v4697_v27, %v4697_v27  ;;  %3601 = vmatprep.subr.bf16.mxu1 %v3984_v29 }
 0x861   : > { %v4701_v28 = vsub.f32 %v2726_v2, %v2750_v62  ;;  %2777 = vadd.xlane.f32.xlu0 %v2765_v23 }
 0x862   : > { %v2742_v24 = vpop.xlane.xlu0 %2741  ;;  %3602 = vmatpush3.bf16.msra.mxu1 %v3765_v60 }
 0x863   : > { %v2751_v32 = vmul.f32 0.0078125, %v2742_v24  ;;  %v2766_v4 = vmul.f32 %v4701_v28, %v4701_v28 }
 0x865   : > { %v4705_v36 = vsub.f32 %v2727_v1, %v2751_v32  ;;  %2779 = vadd.xlane.f32.xlu1 %v2766_v4 }
 0x866   : > { %v2744_v43 = vpop.xlane.xlu1 %2743 }
 0x867   : > { %v2752_v44 = vmul.f32 0.0078125, %v2744_v43  ;;  %v2767_v46 = vmul.f32 %v4705_v36, %v4705_v36 }
 0x869   : > { %v4709_v20 = vsub.f32 %v2728_v63, %v2752_v44  ;;  %2781 = vadd.xlane.f32.xlu0 %v2767_v46 }
 0x86b   : > { %v2768_v49 = vmul.f32 %v4709_v20, %v4709_v20 }
 0x86d   : > { %2783 = vadd.xlane.f32.xlu1 %v2768_v49 }
 0x8da   : > { %v2770_v54 = vpop.xlane.xlu0 %2769 }
 0x8db   : > { %v2785_v21 = vmul.f32 0.0078125, %v2770_v54 }
 0x8dd   : > { %v2793_v58 = vadd.f32 1e-12, %v2785_v21 }
 0x8de   : > { %v2772_v31 = vpop.xlane.xlu0 %2771 }
 0x8df   : > { %v2786_v26 = vmul.f32 0.0078125, %v2772_v31 }
 0x8e1   : > { %v2794_v61 = vadd.f32 1e-12, %v2786_v26 }
 0x8e2   : > { %v2774_v57 = vpop.xlane.xlu1 %2773 }
 0x8e3   : > { %v2787_v42 = vmul.f32 0.0078125, %v2774_v57  ;;  %3850 = vrsqrt.f32 %v2794_v61 }
 0x8e5   : > { %v2795_v40 = vadd.f32 1e-12, %v2787_v42 }
 0x8e6   : > { %v2776_v41 = vpop.xlane.xlu1 %2775 }
 0x8e7   : > { %v2788_v18 = vmul.f32 0.0078125, %v2776_v41  ;;  %3852 = vrsqrt.f32 %v2795_v40 }
 0x8e9   : > { %v2796_v47 = vadd.f32 1e-12, %v2788_v18 }
 0x8ea   : > { %v2778_v5 = vpop.xlane.xlu0 %2777 }
 0x8eb   : > { %3854 = vrsqrt.f32 %v2796_v47  ;;  %v2789_v30 = vmul.f32 0.0078125, %v2778_v5 }
 0x8ec   : > { %3856 = vrsqrt.f32 %v2793_v58 }
 0x8ed   : > { %v2797_v29 = vadd.f32 1e-12, %v2789_v30 }
 0x8ee   : > { %v2780_v6 = vpop.xlane.xlu1 %2779 }
 0x8ef   : > { %3858 = vrsqrt.f32 %v2797_v29  ;;  %v2790_v2 = vmul.f32 0.0078125, %v2780_v6 }
 0x8f0   : > { %v3851_v13 = vpop.eup %3850 }
 0x8f1   : > { %v2798_v33 = vadd.f32 1e-12, %v2790_v2  ;;  %v2810_v8 = vmul.f32 %v3851_v13, %v4685_v38 }
 0x8f2   : > { %v2782_v0 = vpop.xlane.xlu0 %2781 }
 0x8f3   : > { %3860 = vrsqrt.f32 %v2798_v33  ;;  %v2791_v7 = vmul.f32 0.0078125, %v2782_v0  ;;  %v2822_v14 = vmul.f32 %v3318_v15, %v2810_v8 }
 0x8f4   : > { %v3853_v1 = vpop.eup %3852 }
 0x8f5   : > { %v2799_v39 = vadd.f32 1e-12, %v2791_v7  ;;  %v2811_v35 = vmul.f32 %v3853_v1, %v4689_v17  ;;  %v2834_v45 = vadd.f32 %v3319_v50, %v2822_v14 }
 0x8f6   : > { %v2784_v63 = vpop.xlane.xlu1 %2783 }
 0x8f7   : > { %3862 = vrsqrt.f32 %v2799_v39  ;;  %v2792_v52 = vmul.f32 0.0078125, %v2784_v63  ;;  %v2823_v19 = vmul.f32 %v3318_v15, %v2811_v35  ;;  %v2842_v43 = vpack.c.bf16 %v2834_v45, %v2834_v45 }
 0x8f8   : > { %v3855_v53 = vpop.eup %3854 }
 0x8f9   : > { %v2812_v9 = vmul.f32 %v3855_v53, %v4693_v22  ;;  %v2800_v16 = vadd.f32 1e-12, %v2792_v52  ;;  %v3857_v10 = vpop.eup %3856  ;;  %v2835_v24 = vadd.f32 %v3319_v50, %v2823_v19  ;;  %v2881_v51 = vunpack.c.l.b16 %v2842_v43  ;;  %v3320_v52 = vld [vmem:[%s590_s27] ss:$0 sm:$0xff] }
 0x8fa   : > { %v2809_v34 = vmul.f32 %v3857_v10, %v4681_v59 }
 0x8fb   : > { %3864 = vrsqrt.f32 %v2800_v16  ;;  %v2824_v12 = vmul.f32 %v3318_v15, %v2812_v9  ;;  %v2843_v49 = vpack.c.bf16 %v2835_v24, %v2835_v24  ;;  %v2888_v61 = vrot.slane %v2881_v51, 7 }
 0x8fc   : > { %v3859_v25 = vpop.eup %3858  ;;  %v2821_v17 = vmul.f32 %v3318_v15, %v2809_v34 }
 0x8fd   : > { %v2813_v38 = vmul.f32 %v3859_v25, %v4697_v27  ;;  %v2836_v32 = vadd.f32 %v3319_v50, %v2824_v12  ;;  %v2882_v60 = vunpack.c.l.b16 %v2843_v49 }
 0x8fe   : > { %v2833_v11 = vadd.f32 %v3319_v50, %v2821_v17 }
 0x8ff   : > { %v2825_v62 = vmul.f32 %v3318_v15, %v2813_v38  ;;  %v2844_v3 = vpack.c.bf16 %v2836_v32, %v2836_v32  ;;  %v2891_v41 = vrot.slane %v2882_v60, 6 }
 0x900   : > { %v3861_v23 = vpop.eup %3860  ;;  %v2841_v54 = vpack.c.bf16 %v2833_v11, %v2833_v11 }
 0x901   : > { %v2814_v22 = vmul.f32 %v3861_v23, %v4701_v28  ;;  %v2837_v4 = vadd.f32 %v3319_v50, %v2825_v62  ;;  %v2883_v31 = vunpack.c.l.b16 %v2844_v3 }
 0x903   : > { %v2826_v44 = vmul.f32 %v3318_v15, %v2814_v22  ;;  %v2845_v27 = vpack.c.bf16 %v2837_v4, %v2837_v4  ;;  %v2894_v18 = vrot.slane %v2883_v31, 5 }
 0x904   : > { %v3863_v46 = vpop.eup %3862 }
 0x905   : > { %v2838_v59 = vadd.f32 %v3319_v50, %v2826_v44  ;;  %v2815_v37 = vmul.f32 %v3863_v46, %v4705_v36  ;;  %v2884_v57 = vunpack.c.l.b16 %v2845_v27  ;;  %v2880_v36 = vunpack.c.l.b16 %v2841_v54 }
 0x907   : > { %v2846_v48 = vpack.c.bf16 %v2838_v59, %v2838_v59  ;;  %v2827_v56 = vmul.f32 %v3318_v15, %v2815_v37  ;;  %v2897_v5 = vrot.slane %v2884_v57, 4  ;;  %v2890_v30 = vsel %vm2889_vm3, %v2888_v61, %v2880_v36 }
 0x908   : > { %v3865_v55 = vpop.eup %3864 }
 0x909   : > { %v2839_v26 = vadd.f32 %v3319_v50, %v2827_v56  ;;  %v2816_v28 = vmul.f32 %v3865_v55, %v4709_v20  ;;  %v2885_v42 = vunpack.c.l.b16 %v2846_v48  ;;  %v2893_v20 = vsel %vm2892_vm4, %v2891_v41, %v2890_v30 }
 0x90a   : > { %v2896_v0 = vsel %vm2895_vm5, %v2894_v18, %v2893_v20 }
 0x90b   : > { %v2847_v21 = vpack.c.bf16 %v2839_v26, %v2839_v26  ;;  %v2828_v40 = vmul.f32 %v3318_v15, %v2816_v28  ;;  %v2900_v29 = vrot.slane %v2885_v42, 3  ;;  %v2899_v7 = vsel %vm2898_vm6, %v2897_v5, %v2896_v0 }
 0x90d   : > { %v2840_v58 = vadd.f32 %v3319_v50, %v2828_v40  ;;  %v2886_v47 = vunpack.c.l.b16 %v2847_v21  ;;  %v2902_v13 = vsel %vm2901_vm7, %v2900_v29, %v2899_v7 }
 0x90f   : > { %v2848_v6 = vpack.c.bf16 %v2840_v58, %v2840_v58  ;;  %v2903_v2 = vrot.slane %v2886_v47, 2 }
 0x911   : > { %v2887_v33 = vunpack.c.l.b16 %v2848_v6  ;;  %v2905_v39 = vsel %vm2904_vm8, %v2903_v2, %v2902_v13 }
 0x913   : > { %v2906_v1 = vrot.slane %v2887_v33, 1 }
 0x915   : > { %v2908_v63 = vsel %vm2907_vm9, %v2906_v1, %v2905_v39 }
 0x916   : > { %v2909_v8 = vpack.c.b16 %v2908_v63, %v2908_v63 }
 0x918   : > { %3604 = vmatmul.mubr.bf16.vlgmr.msra.gmra.mxu1 %v2909_v8 }
 0x9d8   : > { %v2993_v53 = vpop.f32.mrf.mxu1 }
 0x9d9   : > { %v2994_v35 = vadd.f32 %v3320_v52, %v2993_v53 }
 0x9da   : > { %v3605_v9 = vpop.f32.mrf.mxu1 }
 0x9db   : > { %v2999_v16 = vmax.f32 %v2994_v35, 0.0 }
 0x9dc   : > { %v2996_v10 = vpop.f32.mrf.mxu1 }
 0x9dd   : > { %3000 = vst [vmem:[%s602_s20] sm:$0xff] %v2999_v16 }
 0x9de   : > { %v3606_v15 = vpop.f32.mrf.mxu1 }
 0x9df PF: > { %s26_s18 = sadd.s32 1, %s3977_s18   ;;  %s4784_s29 = sld [smem:[#allocation9_spill]] }
 0x9e0   : > { %p23_p7 = scmp.ge.s32.totalorder %s26_s18, 4   ;;  %s4785_s22 = sld [smem:[#allocation8_spill]] }
 0x9e1   : > { %s4786_s13 = smov %s3961_s14  ;;  %s4787_s14 = smov %s3965_s15 }
 0x9e2   : > { %s4789_s16 = smov %s3973_s17  ;;  %25 = sbr.rel (!%p23_p7) target bundleno = 8 (0x8), region = 137 }
 0x9e5   : > { %s4788_s15 = smov %s4784_s29 }
 0x9e6   : > { %s4790_s17 = smov %s4785_s22 }
 0x9e7   :  { %3026 = vsyncpa [#allocation3], 1 }
 0x9e8   :  { %3028 = vsyncpa [#allocation3 + $0x1], 1 }
 0x9e9   :  { %3029 = vsyncpa [#allocation5], 1 }
 0x9ea   :  { %3031 = vsyncpa [#allocation5 + $0x1], 1 }

</bundles_post_ra>
